<compile_context>
chip_gen: v5e
topology: v5e:2x2
jax: 0.10.0
libtpu: 0.0.40
codegen_flags: <defaults>
</compile_context>

<pallas_src>
import functools

import numpy as np

import jax
import jax.numpy as jnp
from jax.experimental import pallas as pl
from jax.experimental.pallas import tpu as pltpu


def _round_up(v, m):
    return ((v + m - 1) // m) * m


# ----------------------------------------------------------------------------
# Fused Pallas kernel: conv1+BN+ReLU -> pool -> conv2+BN+ReLU -> pool -> FC
# ----------------------------------------------------------------------------
def _fused_cnn_kernel(x_ref, w1_ref, sh1_ref, sp_ref, w2_ref, sh2_ref,
                      fw_ref, fb_ref, out_ref, *,
                      n_img, wp, off1, wa1, l1, hpwp,
                      w1p, off2, wout2, l2m, stride2, anchors):
    """Activations are (channels, flattened zero-padded raster) slabs.

    Stage-1 raster: images back-to-back, row stride wp, starting at lane `off1`
    of the input slab (zero slack on both sides -> every tap is a static slice).
    Stage-2 raster: one 128-lane block per image (padded 10x10 raster at its
    start), preceded by `off2` zero lanes of slack.
    Garbage conv outputs at padded/border columns are never selected downstream.
    """
    f32, bf16 = jnp.float32, jnp.bfloat16
    c1 = w1_ref.shape[0]

    # ---- Stage 1: Conv(3 -> C1, 3x3, pad=1) as ONE K-stacked matmul (K=72). ----
    x = x_ref[...]                                                  # (8, slab_w) f32
    taps1 = [oy * wp + ox for oy in (-1, 0, 1) for ox in (-1, 0, 1)]
    rhs1 = jnp.concatenate([x[:, off1 + d: off1 + d + wa1] for d in taps1],
                           axis=0)                                  # (72, wa1) f32
    a1 = jnp.dot(w1_ref[...], rhs1.astype(bf16),
                 preferred_element_type=f32)                        # (C1, wa1) f32
    a1 = jnp.maximum(a1 + sh1_ref[...], 0.0)                        # folded-BN shift + ReLU

    # ---- MaxPool 2x2/2: shifted-slab max + per-image anchor-select/re-pad matmul.
    m1 = jnp.maximum(jnp.maximum(a1[:, 0:l1], a1[:, 1:l1 + 1]),
                     jnp.maximum(a1[:, wp:wp + l1], a1[:, wp + 1:wp + 1 + l1]))
    sp = sp_ref[...]                                                # (hpwp, 128) bf16, shared
    pooled = [jnp.dot(m1[:, n * hpwp:(n + 1) * hpwp].astype(bf16), sp,
                      preferred_element_type=f32)                   # (C1, 128) f32
              for n in range(n_img)]
    a2in = jnp.concatenate([jnp.zeros((c1, off2), f32)] + pooled, axis=1)

    # ---- Stage 2: Conv(C1 -> C2, 3x3, pad=1) as ONE K-stacked matmul (K=72). ---
    taps2 = [oy * w1p + ox for oy in (-1, 0, 1) for ox in (-1, 0, 1)]
    rhs2 = jnp.concatenate([a2in[:, off2 + d: off2 + d + wout2] for d in taps2],
                           axis=0)                                  # (72, wout2) f32
    a2 = jnp.dot(w2_ref[...], rhs2.astype(bf16),
                 preferred_element_type=f32)                        # (C2, wout2) f32
    a2 = jnp.maximum(a2 + sh2_ref[...], 0.0)

    # ---- MaxPool 2x2/2 (anchors only consumed below). --------------------------
    m2 = jnp.maximum(jnp.maximum(a2[:, 0:l2m], a2[:, 1:l2m + 1]),
                     jnp.maximum(a2[:, w1p:w1p + l2m], a2[:, w1p + 1:w1p + 1 + l2m]))

    # ---- Fused FC head: f32 anchor gather via static slices + one K=256 matmul.
    pieces = []
    for a in anchors:                                               # k = y3*W3 + x3 order
        cols = [m2[:, n * stride2 + a: n * stride2 + a + 1] for n in range(n_img)]
        pieces.append(jnp.concatenate(cols, axis=1))                # (C2, N)
    featK = jnp.concatenate(pieces, axis=0)                         # (H3*W3*C2, N) f32
    out = jnp.dot(fw_ref[...], featK, preferred_element_type=f32) + fb_ref[...]
    out_ref[...] = out.T                                            # (N, 12) f32


def _fused_cnn_call(x_slab, w1s, sh1, selP, w2s, sh2, fcw, fcb, *, n_img, **statics):
    kernel = functools.partial(_fused_cnn_kernel, n_img=n_img, **statics)
    operands = (x_slab, w1s, sh1, selP, w2s, sh2, fcw, fcb)
    return pl.pallas_call(
        kernel,
        out_shape=jax.ShapeDtypeStruct((n_img, fcw.shape[0]), jnp.float32),
        grid=(1,),  # whole problem fits in VMEM (<0.5 MiB) -> single launch
        in_specs=[pl.BlockSpec(op.shape, lambda i: (0, 0)) for op in operands],
        out_specs=pl.BlockSpec((n_img, fcw.shape[0]), lambda i: (0, 0)),
        compiler_params=pltpu.CompilerParams(dimension_semantics=("arbitrary",)),
    )(*operands)


# ----------------------------------------------------------------------------
# Host-side operand preparation (tiny; fused by XLA under jit)
# ----------------------------------------------------------------------------
def _fold_batchnorm(conv_bias, gamma, beta, mean, var, eps=1e-5):
    scale = gamma / jnp.sqrt(var + eps)
    shift = (conv_bias - mean) * scale + beta
    return scale.astype(jnp.float32), shift[:, None].astype(jnp.float32)


# ----------------------------------------------------------------------------
# Model
# ----------------------------------------------------------------------------
def init_params(key, cfg):
    c1, k1 = cfg["conv2d_1_out"], cfg["conv2d_1_kernel_size"]
    c2, k2 = cfg["conv2d_2_out"], cfg["conv2d_2_kernel_size"]
    new_w = int(cfg["img_w"] / (cfg["pool_1_kernel_size"] * cfg["pool_2_kernel_size"]))
    fc_in = c2 * new_w * new_w
    ks = jax.random.split(key, 8)
    return {
        "conv1_w": 0.1 * jax.random.normal(ks[0], (c1, 3, k1, k1), jnp.float32),
        "conv1_b": 0.1 * jax.random.normal(ks[1], (c1,), jnp.float32),
        "bn1_gamma": 1.0 + 0.1 * jax.random.normal(ks[2], (c1,), jnp.float32),
        "bn1_beta": 0.1 * jax.random.normal(ks[3], (c1,), jnp.float32),
        "bn1_mean": jnp.zeros((c1,), jnp.float32),
        "bn1_var": jnp.ones((c1,), jnp.float32),
        "conv2_w": 0.1 * jax.random.normal(ks[4], (c2, c1, k2, k2), jnp.float32),
        "conv2_b": 0.1 * jax.random.normal(ks[5], (c2,), jnp.float32),
        "bn2_gamma": 1.0 + 0.1 * jax.random.normal(ks[6], (c2,), jnp.float32),
        "bn2_beta": 0.1 * jax.random.normal(ks[7], (c2,), jnp.float32),
        "bn2_mean": jnp.zeros((c2,), jnp.float32),
        "bn2_var": jnp.ones((c2,), jnp.float32),
        "fc_w": 0.05 * jax.random.normal(jax.random.fold_in(key, 100), (12, fc_in), jnp.float32),
        "fc_b": 0.05 * jax.random.normal(jax.random.fold_in(key, 101), (12,), jnp.float32),
    }


def cnn_forward(params, x_nchw, cfg):
    k1, k2 = cfg["conv2d_1_kernel_size"], cfg["conv2d_2_kernel_size"]
    p1, p2 = cfg["pool_1_kernel_size"], cfg["pool_2_kernel_size"]
    c1, c2 = cfg["conv2d_1_out"], cfg["conv2d_2_out"]
    assert k1 == 3 and k2 == 3, "conv padding=1 is 'same' only for kernel_size=3"
    assert p1 == 2 and p2 == 2, "fused pooling implemented for 2x2 / stride-2"

    n, cin, h, w = x_nchw.shape
    assert cin == 3 and h % 4 == 0 and w % 4 == 0

    # ---- static geometry -------------------------------------------------------
    hp, wp = h + 2, w + 2                         # stage-1 padded image
    hpwp = hp * wp
    l1 = n * hpwp                                 # stage-1 padded raster length
    off1 = wp + 1                                 # slack for +/-(wp+1) tap shifts
    wa1 = l1 + wp + 1                             # conv1 output width (pool slack incl.)
    slab_w = _round_up(wa1 + 2 * (wp + 1), 128)

    h1, w1 = h // 2, w // 2
    h1p, w1p = h1 + 2, w1 + 2                     # stage-2 padded image
    off2 = w1p + 1
    stride2 = 128                                 # per-image lane block in stage 2
    assert h1p * w1p <= stride2
    h3, w3 = h // 4, w // 4
    max_anchor = (2 * (h3 - 1) + 1) * w1p + (2 * (w3 - 1) + 1)
    l2m = (n - 1) * stride2 + max_anchor + 1      # pool-2 max width
    wout2 = l2m + w1p + 1                         # conv2 output width
    cin_pad = 8

    f32, bf16 = jnp.float32, jnp.bfloat16

    # ---- input -> (channels, flattened padded raster) f32 slab -----------------
    xpad = jnp.pad(x_nchw, ((0, 0), (0, 0), (1, 1), (1, 1)))          # (N, 3, Hp, Wp)
    xt = jnp.transpose(xpad, (1, 0, 2, 3)).reshape(cin, l1)
    x_slab = jnp.zeros((cin_pad, slab_w), f32).at[:cin, off1:off1 + l1].set(xt.astype(f32))

    # ---- fold eval-mode BN: scale -> weights, shift -> per-channel add ---------
    sc1, sh1 = _fold_batchnorm(params["conv1_b"], params["bn1_gamma"], params["bn1_beta"],
                               params["bn1_mean"], params["bn1_var"])
    sc2, sh2 = _fold_batchnorm(params["conv2_b"], params["bn2_gamma"], params["bn2_beta"],
                               params["bn2_mean"], params["bn2_var"])

    # ---- conv weights -> K-stacked (Cout, 9*Cin_pad) matrices, BN-scale folded -
    w1t = jnp.transpose(params["conv1_w"], (0, 2, 3, 1))               # (c1, 3, 3, 3)
    w1t = jnp.pad(w1t, ((0, 0), (0, 0), (0, 0), (0, cin_pad - cin)))   # (c1, 3, 3, 8)
    w1s = (w1t.reshape(c1, 9 * cin_pad) * sc1[:, None]).astype(bf16)   # (c1, 72)
    w2t = jnp.transpose(params["conv2_w"], (0, 2, 3, 1))               # (c2, 3, 3, c1)
    w2s = (w2t.reshape(c2, 9 * c1) * sc2[:, None]).astype(bf16)        # (c2, 72)

    # ---- per-image (shared across batch) pool-1 select + re-pad matrix ---------
    sp = np.zeros((hpwp, stride2), np.float32)
    for y1 in range(h1):
        for x1 in range(w1):
            sp[(2 * y1 + 1) * wp + (2 * x1 + 1), (y1 + 1) * w1p + (x1 + 1)] = 1.0
    selP = jnp.asarray(sp, bf16)                                       # (324, 128)

    # ---- FC weights permuted to match featK row order (k*c2 + c) ---------------
    fcw = params["fc_w"].reshape(-1, c2, h3 * w3).transpose(0, 2, 1)
    fcw = fcw.reshape(-1, c2 * h3 * w3).astype(f32)                    # (12, 256)
    fcb = params["fc_b"].reshape(-1, 1).astype(f32)                    # (12, 1)

    anchors = tuple((2 * y3 + 1) * w1p + (2 * x3 + 1)
                    for y3 in range(h3) for x3 in range(w3))

    # TODO(synk): F.dropout after pool-1 defaults to training=True (random mask +
    # 1/(1-p) scaling); implemented as identity (inference semantics).

    return _fused_cnn_call(
        x_slab, w1s, sh1, selP, w2s, sh2, fcw, fcb,
        n_img=n, wp=wp, off1=off1, wa1=wa1, l1=l1, hpwp=hpwp,
        w1p=w1p, off2=off2, wout2=wout2, l2m=l2m, stride2=stride2,
        anchors=anchors)                                               # (N, 12) f32


# ----------------------------------------------------------------------------
# Pure-JAX reference (numerical sanity check)
# ----------------------------------------------------------------------------
def reference_forward(params, x, eps=1e-5):
    hi = jax.lax.Precision.HIGHEST

    def conv_bn_relu(y, wgt, b, g, bt, mu, var):
        y = jax.lax.conv_general_dilated(y, wgt, window_strides=(1, 1),
                                         padding=((1, 1), (1, 1)),
                                         dimension_numbers=("NCHW", "OIHW", "NCHW"),
                                         precision=hi)
        y = y + b[None, :, None, None]
        y = (y - mu[None, :, None, None]) * (g[None, :, None, None]
                                             / jnp.sqrt(var[None, :, None, None] + eps))
        y = y + bt[None, :, None, None]
        return jnp.maximum(y, 0.0)

    def maxpool2(y):
        nb, c, hh, ww = y.shape
        return y.reshape(nb, c, hh // 2, 2, ww // 2, 2).max(axis=(3, 5))

    y = conv_bn_relu(x, params["conv1_w"], params["conv1_b"], params["bn1_gamma"],
                     params["bn1_beta"], params["bn1_mean"], params["bn1_var"])
    y = maxpool2(y)   # dropout: identity (inference)
    y = conv_bn_relu(y, params["conv2_w"], params["conv2_b"], params["bn2_gamma"],
                     params["bn2_beta"], params["bn2_mean"], params["bn2_var"])
    y = maxpool2(y)
    y = y.reshape(y.shape[0], -1)
    return jnp.dot(y, params["fc_w"].T, precision=hi) + params["fc_b"]


if __name__ == "__main__":
    cfg = {
        "drop_out": 0.2,
        "conv2d_1_out": 8,
        "conv2d_1_kernel_size": 3,
        "pool_1_kernel_size": 2,
        "conv2d_2_out": 16,
        "conv2d_2_kernel_size": 3,
        "pool_2_kernel_size": 2,
        "img_w": 16,
    }
    key = jax.random.PRNGKey(0)
    k_params, k_x = jax.random.split(key)
    params = init_params(k_params, cfg)
    x = jax.random.normal(k_x, (2, 3, cfg["img_w"], cfg["img_w"]), jnp.float32)  # NCHW

    fwd = jax.jit(functools.partial(cnn_forward, cfg=cfg))
    out = jax.block_until_ready(fwd(params, x))
    assert out.shape == (2, 12) and out.dtype == jnp.float32

    # bf16 MXU operands (f32 accumulation, f32 feature gather + FC) -> tighter
    # tolerance than before.
    ref = jax.block_until_ready(reference_forward(params, x))
    assert jnp.allclose(out, ref, rtol=3e-2, atol=3e-2), "kernel/reference mismatch"

    print("KERNEL_OK")
</pallas_src>

<mosaic_0001>
module attributes {stable_mosaic.version = 11 : i64} {
  func.func @_fused_cnn_kernel(%arg0: i32, %arg1: memref<8x768xf32, #tpu.memory_space<vmem>>, %arg2: memref<8x72xbf16, #tpu.memory_space<vmem>>, %arg3: memref<8x1xf32, #tpu.memory_space<vmem>>, %arg4: memref<324x128xbf16, #tpu.memory_space<vmem>>, %arg5: memref<16x72xbf16, #tpu.memory_space<vmem>>, %arg6: memref<16x1xf32, #tpu.memory_space<vmem>>, %arg7: memref<12x256xf32, #tpu.memory_space<vmem>>, %arg8: memref<12x1xf32, #tpu.memory_space<vmem>>, %arg9: memref<2x12xf32, #tpu.memory_space<vmem>>) attributes {dimension_semantics = [#tpu.dimension_semantics<arbitrary>], iteration_bounds = array<i64: 1>, scalar_prefetch = 0 : i64, scratch_operands = 0 : i64, tpu.core_type = #tpu.core_type<tc>, window_params = [{pipeline_mode = #tpu.pipeline_mode<synchronous>, transform_indices = @transform_0, window_bounds = array<i64: 8, 768>}, {pipeline_mode = #tpu.pipeline_mode<synchronous>, transform_indices = @transform_1, window_bounds = array<i64: 8, 72>}, {pipeline_mode = #tpu.pipeline_mode<synchronous>, transform_indices = @transform_2, window_bounds = array<i64: 8, 1>}, {pipeline_mode = #tpu.pipeline_mode<synchronous>, transform_indices = @transform_3, window_bounds = array<i64: 324, 128>}, {pipeline_mode = #tpu.pipeline_mode<synchronous>, transform_indices = @transform_4, window_bounds = array<i64: 16, 72>}, {pipeline_mode = #tpu.pipeline_mode<synchronous>, transform_indices = @transform_5, window_bounds = array<i64: 16, 1>}, {pipeline_mode = #tpu.pipeline_mode<synchronous>, transform_indices = @transform_6, window_bounds = array<i64: 12, 256>}, {pipeline_mode = #tpu.pipeline_mode<synchronous>, transform_indices = @transform_7, window_bounds = array<i64: 12, 1>}, {pipeline_mode = #tpu.pipeline_mode<synchronous>, transform_indices = @transform_8, window_bounds = array<i64: 2, 12>}]} {
    %c0 = arith.constant 0 : index
    %c0_0 = arith.constant 0 : index
    %0 = vector.load %arg1[%c0, %c0_0] : memref<8x768xf32, #tpu.memory_space<vmem>>, vector<8x768xf32>
    %1 = vector.extract_strided_slice %0 {offsets = [0, 0], sizes = [8, 667], strides = [1, 1]} : vector<8x768xf32> to vector<8x667xf32>
    %2 = vector.extract_strided_slice %0 {offsets = [0, 1], sizes = [8, 667], strides = [1, 1]} : vector<8x768xf32> to vector<8x667xf32>
    %3 = vector.extract_strided_slice %0 {offsets = [0, 2], sizes = [8, 667], strides = [1, 1]} : vector<8x768xf32> to vector<8x667xf32>
    %4 = vector.extract_strided_slice %0 {offsets = [0, 18], sizes = [8, 667], strides = [1, 1]} : vector<8x768xf32> to vector<8x667xf32>
    %5 = vector.extract_strided_slice %0 {offsets = [0, 19], sizes = [8, 667], strides = [1, 1]} : vector<8x768xf32> to vector<8x667xf32>
    %6 = vector.extract_strided_slice %0 {offsets = [0, 20], sizes = [8, 667], strides = [1, 1]} : vector<8x768xf32> to vector<8x667xf32>
    %7 = vector.extract_strided_slice %0 {offsets = [0, 36], sizes = [8, 667], strides = [1, 1]} : vector<8x768xf32> to vector<8x667xf32>
    %8 = vector.extract_strided_slice %0 {offsets = [0, 37], sizes = [8, 667], strides = [1, 1]} : vector<8x768xf32> to vector<8x667xf32>
    %9 = vector.extract_strided_slice %0 {offsets = [0, 38], sizes = [8, 667], strides = [1, 1]} : vector<8x768xf32> to vector<8x667xf32>
    %10 = tpu.concatenate %1, %2, %3, %4, %5, %6, %7, %8, %9 in 0 : vector<8x667xf32>, vector<8x667xf32>, vector<8x667xf32>, vector<8x667xf32>, vector<8x667xf32>, vector<8x667xf32>, vector<8x667xf32>, vector<8x667xf32>, vector<8x667xf32> -> vector<72x667xf32>
    %c0_1 = arith.constant 0 : index
    %c0_2 = arith.constant 0 : index
    %11 = vector.load %arg2[%c0_1, %c0_2] : memref<8x72xbf16, #tpu.memory_space<vmem>>, vector<8x72xbf16>
    %12 = arith.truncf %10 : vector<72x667xf32> to vector<72x667xbf16>
    %cst = arith.constant dense<0.000000e+00> : vector<8x667xf32>
    %13 = tpu.matmul %11, %12, %cst {dimension_numbers = #tpu.dot_dimension_numbers<[1], [0], [0], [1], [0, 0, 1, 1], [], []>} : vector<8x72xbf16>, vector<72x667xbf16>, vector<8x667xf32> -> vector<8x667xf32>
    %c0_3 = arith.constant 0 : index
    %c0_4 = arith.constant 0 : index
    %14 = vector.load %arg3[%c0_3, %c0_4] : memref<8x1xf32, #tpu.memory_space<vmem>>, vector<8x1xf32>
    %15 = vector.broadcast %14 : vector<8x1xf32> to vector<8x667xf32>
    %16 = arith.addf %13, %15 : vector<8x667xf32>
    %cst_5 = arith.constant 0.000000e+00 : f32
    %17 = vector.broadcast %cst_5 : f32 to vector<8x667xf32>
    %18 = arith.maximumf %16, %17 : vector<8x667xf32>
    %19 = vector.extract_strided_slice %18 {offsets = [0, 0], sizes = [8, 648], strides = [1, 1]} : vector<8x667xf32> to vector<8x648xf32>
    %20 = vector.extract_strided_slice %18 {offsets = [0, 1], sizes = [8, 648], strides = [1, 1]} : vector<8x667xf32> to vector<8x648xf32>
    %21 = arith.maximumf %19, %20 : vector<8x648xf32>
    %22 = vector.extract_strided_slice %18 {offsets = [0, 18], sizes = [8, 648], strides = [1, 1]} : vector<8x667xf32> to vector<8x648xf32>
    %23 = vector.extract_strided_slice %18 {offsets = [0, 19], sizes = [8, 648], strides = [1, 1]} : vector<8x667xf32> to vector<8x648xf32>
    %24 = arith.maximumf %22, %23 : vector<8x648xf32>
    %25 = arith.maximumf %21, %24 : vector<8x648xf32>
    %c0_6 = arith.constant 0 : index
    %c0_7 = arith.constant 0 : index
    %26 = vector.load %arg4[%c0_6, %c0_7] : memref<324x128xbf16, #tpu.memory_space<vmem>>, vector<324x128xbf16>
    %27 = vector.extract_strided_slice %25 {offsets = [0, 0], sizes = [8, 324], strides = [1, 1]} : vector<8x648xf32> to vector<8x324xf32>
    %28 = arith.truncf %27 : vector<8x324xf32> to vector<8x324xbf16>
    %cst_8 = arith.constant dense<0.000000e+00> : vector<8x128xf32>
    %29 = tpu.matmul %28, %26, %cst_8 {dimension_numbers = #tpu.dot_dimension_numbers<[1], [0], [0], [1], [0, 0, 1, 1], [], []>} : vector<8x324xbf16>, vector<324x128xbf16>, vector<8x128xf32> -> vector<8x128xf32>
    %30 = vector.extract_strided_slice %25 {offsets = [0, 324], sizes = [8, 324], strides = [1, 1]} : vector<8x648xf32> to vector<8x324xf32>
    %31 = arith.truncf %30 : vector<8x324xf32> to vector<8x324xbf16>
    %cst_9 = arith.constant dense<0.000000e+00> : vector<8x128xf32>
    %32 = tpu.matmul %31, %26, %cst_9 {dimension_numbers = #tpu.dot_dimension_numbers<[1], [0], [0], [1], [0, 0, 1, 1], [], []>} : vector<8x324xbf16>, vector<324x128xbf16>, vector<8x128xf32> -> vector<8x128xf32>
    %cst_10 = arith.constant 0.000000e+00 : f32
    %33 = vector.broadcast %cst_10 : f32 to vector<8x11xf32>
    %34 = tpu.concatenate %33, %29, %32 in 1 : vector<8x11xf32>, vector<8x128xf32>, vector<8x128xf32> -> vector<8x267xf32>
    %35 = vector.extract_strided_slice %34 {offsets = [0, 0], sizes = [8, 217], strides = [1, 1]} : vector<8x267xf32> to vector<8x217xf32>
    %36 = vector.extract_strided_slice %34 {offsets = [0, 1], sizes = [8, 217], strides = [1, 1]} : vector<8x267xf32> to vector<8x217xf32>
    %37 = vector.extract_strided_slice %34 {offsets = [0, 2], sizes = [8, 217], strides = [1, 1]} : vector<8x267xf32> to vector<8x217xf32>
    %38 = vector.extract_strided_slice %34 {offsets = [0, 10], sizes = [8, 217], strides = [1, 1]} : vector<8x267xf32> to vector<8x217xf32>
    %39 = vector.extract_strided_slice %34 {offsets = [0, 11], sizes = [8, 217], strides = [1, 1]} : vector<8x267xf32> to vector<8x217xf32>
    %40 = vector.extract_strided_slice %34 {offsets = [0, 12], sizes = [8, 217], strides = [1, 1]} : vector<8x267xf32> to vector<8x217xf32>
    %41 = vector.extract_strided_slice %34 {offsets = [0, 20], sizes = [8, 217], strides = [1, 1]} : vector<8x267xf32> to vector<8x217xf32>
    %42 = vector.extract_strided_slice %34 {offsets = [0, 21], sizes = [8, 217], strides = [1, 1]} : vector<8x267xf32> to vector<8x217xf32>
    %43 = vector.extract_strided_slice %34 {offsets = [0, 22], sizes = [8, 217], strides = [1, 1]} : vector<8x267xf32> to vector<8x217xf32>
    %44 = tpu.concatenate %35, %36, %37, %38, %39, %40, %41, %42, %43 in 0 : vector<8x217xf32>, vector<8x217xf32>, vector<8x217xf32>, vector<8x217xf32>, vector<8x217xf32>, vector<8x217xf32>, vector<8x217xf32>, vector<8x217xf32>, vector<8x217xf32> -> vector<72x217xf32>
    %c0_11 = arith.constant 0 : index
    %c0_12 = arith.constant 0 : index
    %45 = vector.load %arg5[%c0_11, %c0_12] : memref<16x72xbf16, #tpu.memory_space<vmem>>, vector<16x72xbf16>
    %46 = arith.truncf %44 : vector<72x217xf32> to vector<72x217xbf16>
    %cst_13 = arith.constant dense<0.000000e+00> : vector<16x217xf32>
    %47 = tpu.matmul %45, %46, %cst_13 {dimension_numbers = #tpu.dot_dimension_numbers<[1], [0], [0], [1], [0, 0, 1, 1], [], []>} : vector<16x72xbf16>, vector<72x217xbf16>, vector<16x217xf32> -> vector<16x217xf32>
    %c0_14 = arith.constant 0 : index
    %c0_15 = arith.constant 0 : index
    %48 = vector.load %arg6[%c0_14, %c0_15] : memref<16x1xf32, #tpu.memory_space<vmem>>, vector<16x1xf32>
    %49 = vector.broadcast %48 : vector<16x1xf32> to vector<16x217xf32>
    %50 = arith.addf %47, %49 : vector<16x217xf32>
    %cst_16 = arith.constant 0.000000e+00 : f32
    %51 = vector.broadcast %cst_16 : f32 to vector<16x217xf32>
    %52 = arith.maximumf %50, %51 : vector<16x217xf32>
    %53 = vector.extract_strided_slice %52 {offsets = [0, 0], sizes = [16, 206], strides = [1, 1]} : vector<16x217xf32> to vector<16x206xf32>
    %54 = vector.extract_strided_slice %52 {offsets = [0, 1], sizes = [16, 206], strides = [1, 1]} : vector<16x217xf32> to vector<16x206xf32>
    %55 = arith.maximumf %53, %54 : vector<16x206xf32>
    %56 = vector.extract_strided_slice %52 {offsets = [0, 10], sizes = [16, 206], strides = [1, 1]} : vector<16x217xf32> to vector<16x206xf32>
    %57 = vector.extract_strided_slice %52 {offsets = [0, 11], sizes = [16, 206], strides = [1, 1]} : vector<16x217xf32> to vector<16x206xf32>
    %58 = arith.maximumf %56, %57 : vector<16x206xf32>
    %59 = arith.maximumf %55, %58 : vector<16x206xf32>
    %60 = vector.extract_strided_slice %59 {offsets = [0, 11], sizes = [16, 1], strides = [1, 1]} : vector<16x206xf32> to vector<16x1xf32>
    %61 = vector.extract_strided_slice %59 {offsets = [0, 139], sizes = [16, 1], strides = [1, 1]} : vector<16x206xf32> to vector<16x1xf32>
    %62 = tpu.concatenate %60, %61 in 1 : vector<16x1xf32>, vector<16x1xf32> -> vector<16x2xf32>
    %63 = vector.extract_strided_slice %59 {offsets = [0, 13], sizes = [16, 1], strides = [1, 1]} : vector<16x206xf32> to vector<16x1xf32>
    %64 = vector.extract_strided_slice %59 {offsets = [0, 141], sizes = [16, 1], strides = [1, 1]} : vector<16x206xf32> to vector<16x1xf32>
    %65 = tpu.concatenate %63, %64 in 1 : vector<16x1xf32>, vector<16x1xf32> -> vector<16x2xf32>
    %66 = vector.extract_strided_slice %59 {offsets = [0, 15], sizes = [16, 1], strides = [1, 1]} : vector<16x206xf32> to vector<16x1xf32>
    %67 = vector.extract_strided_slice %59 {offsets = [0, 143], sizes = [16, 1], strides = [1, 1]} : vector<16x206xf32> to vector<16x1xf32>
    %68 = tpu.concatenate %66, %67 in 1 : vector<16x1xf32>, vector<16x1xf32> -> vector<16x2xf32>
    %69 = vector.extract_strided_slice %59 {offsets = [0, 17], sizes = [16, 1], strides = [1, 1]} : vector<16x206xf32> to vector<16x1xf32>
    %70 = vector.extract_strided_slice %59 {offsets = [0, 145], sizes = [16, 1], strides = [1, 1]} : vector<16x206xf32> to vector<16x1xf32>
    %71 = tpu.concatenate %69, %70 in 1 : vector<16x1xf32>, vector<16x1xf32> -> vector<16x2xf32>
    %72 = vector.extract_strided_slice %59 {offsets = [0, 31], sizes = [16, 1], strides = [1, 1]} : vector<16x206xf32> to vector<16x1xf32>
    %73 = vector.extract_strided_slice %59 {offsets = [0, 159], sizes = [16, 1], strides = [1, 1]} : vector<16x206xf32> to vector<16x1xf32>
    %74 = tpu.concatenate %72, %73 in 1 : vector<16x1xf32>, vector<16x1xf32> -> vector<16x2xf32>
    %75 = vector.extract_strided_slice %59 {offsets = [0, 33], sizes = [16, 1], strides = [1, 1]} : vector<16x206xf32> to vector<16x1xf32>
    %76 = vector.extract_strided_slice %59 {offsets = [0, 161], sizes = [16, 1], strides = [1, 1]} : vector<16x206xf32> to vector<16x1xf32>
    %77 = tpu.concatenate %75, %76 in 1 : vector<16x1xf32>, vector<16x1xf32> -> vector<16x2xf32>
    %78 = vector.extract_strided_slice %59 {offsets = [0, 35], sizes = [16, 1], strides = [1, 1]} : vector<16x206xf32> to vector<16x1xf32>
    %79 = vector.extract_strided_slice %59 {offsets = [0, 163], sizes = [16, 1], strides = [1, 1]} : vector<16x206xf32> to vector<16x1xf32>
    %80 = tpu.concatenate %78, %79 in 1 : vector<16x1xf32>, vector<16x1xf32> -> vector<16x2xf32>
    %81 = vector.extract_strided_slice %59 {offsets = [0, 37], sizes = [16, 1], strides = [1, 1]} : vector<16x206xf32> to vector<16x1xf32>
    %82 = vector.extract_strided_slice %59 {offsets = [0, 165], sizes = [16, 1], strides = [1, 1]} : vector<16x206xf32> to vector<16x1xf32>
    %83 = tpu.concatenate %81, %82 in 1 : vector<16x1xf32>, vector<16x1xf32> -> vector<16x2xf32>
    %84 = vector.extract_strided_slice %59 {offsets = [0, 51], sizes = [16, 1], strides = [1, 1]} : vector<16x206xf32> to vector<16x1xf32>
    %85 = vector.extract_strided_slice %59 {offsets = [0, 179], sizes = [16, 1], strides = [1, 1]} : vector<16x206xf32> to vector<16x1xf32>
    %86 = tpu.concatenate %84, %85 in 1 : vector<16x1xf32>, vector<16x1xf32> -> vector<16x2xf32>
    %87 = vector.extract_strided_slice %59 {offsets = [0, 53], sizes = [16, 1], strides = [1, 1]} : vector<16x206xf32> to vector<16x1xf32>
    %88 = vector.extract_strided_slice %59 {offsets = [0, 181], sizes = [16, 1], strides = [1, 1]} : vector<16x206xf32> to vector<16x1xf32>
    %89 = tpu.concatenate %87, %88 in 1 : vector<16x1xf32>, vector<16x1xf32> -> vector<16x2xf32>
    %90 = vector.extract_strided_slice %59 {offsets = [0, 55], sizes = [16, 1], strides = [1, 1]} : vector<16x206xf32> to vector<16x1xf32>
    %91 = vector.extract_strided_slice %59 {offsets = [0, 183], sizes = [16, 1], strides = [1, 1]} : vector<16x206xf32> to vector<16x1xf32>
    %92 = tpu.concatenate %90, %91 in 1 : vector<16x1xf32>, vector<16x1xf32> -> vector<16x2xf32>
    %93 = vector.extract_strided_slice %59 {offsets = [0, 57], sizes = [16, 1], strides = [1, 1]} : vector<16x206xf32> to vector<16x1xf32>
    %94 = vector.extract_strided_slice %59 {offsets = [0, 185], sizes = [16, 1], strides = [1, 1]} : vector<16x206xf32> to vector<16x1xf32>
    %95 = tpu.concatenate %93, %94 in 1 : vector<16x1xf32>, vector<16x1xf32> -> vector<16x2xf32>
    %96 = vector.extract_strided_slice %59 {offsets = [0, 71], sizes = [16, 1], strides = [1, 1]} : vector<16x206xf32> to vector<16x1xf32>
    %97 = vector.extract_strided_slice %59 {offsets = [0, 199], sizes = [16, 1], strides = [1, 1]} : vector<16x206xf32> to vector<16x1xf32>
    %98 = tpu.concatenate %96, %97 in 1 : vector<16x1xf32>, vector<16x1xf32> -> vector<16x2xf32>
    %99 = vector.extract_strided_slice %59 {offsets = [0, 73], sizes = [16, 1], strides = [1, 1]} : vector<16x206xf32> to vector<16x1xf32>
    %100 = vector.extract_strided_slice %59 {offsets = [0, 201], sizes = [16, 1], strides = [1, 1]} : vector<16x206xf32> to vector<16x1xf32>
    %101 = tpu.concatenate %99, %100 in 1 : vector<16x1xf32>, vector<16x1xf32> -> vector<16x2xf32>
    %102 = vector.extract_strided_slice %59 {offsets = [0, 75], sizes = [16, 1], strides = [1, 1]} : vector<16x206xf32> to vector<16x1xf32>
    %103 = vector.extract_strided_slice %59 {offsets = [0, 203], sizes = [16, 1], strides = [1, 1]} : vector<16x206xf32> to vector<16x1xf32>
    %104 = tpu.concatenate %102, %103 in 1 : vector<16x1xf32>, vector<16x1xf32> -> vector<16x2xf32>
    %105 = vector.extract_strided_slice %59 {offsets = [0, 77], sizes = [16, 1], strides = [1, 1]} : vector<16x206xf32> to vector<16x1xf32>
    %106 = vector.extract_strided_slice %59 {offsets = [0, 205], sizes = [16, 1], strides = [1, 1]} : vector<16x206xf32> to vector<16x1xf32>
    %107 = tpu.concatenate %105, %106 in 1 : vector<16x1xf32>, vector<16x1xf32> -> vector<16x2xf32>
    %108 = tpu.concatenate %62, %65, %68, %71, %74, %77, %80, %83, %86, %89, %92, %95, %98, %101, %104, %107 in 0 : vector<16x2xf32>, vector<16x2xf32>, vector<16x2xf32>, vector<16x2xf32>, vector<16x2xf32>, vector<16x2xf32>, vector<16x2xf32>, vector<16x2xf32>, vector<16x2xf32>, vector<16x2xf32>, vector<16x2xf32>, vector<16x2xf32>, vector<16x2xf32>, vector<16x2xf32>, vector<16x2xf32>, vector<16x2xf32> -> vector<256x2xf32>
    %c0_17 = arith.constant 0 : index
    %c0_18 = arith.constant 0 : index
    %109 = vector.load %arg7[%c0_17, %c0_18] : memref<12x256xf32, #tpu.memory_space<vmem>>, vector<12x256xf32>
    %cst_19 = arith.constant dense<0.000000e+00> : vector<12x2xf32>
    %110 = tpu.matmul %109, %108, %cst_19 {dimension_numbers = #tpu.dot_dimension_numbers<[1], [0], [0], [1], [0, 0, 1, 1], [], []>} : vector<12x256xf32>, vector<256x2xf32>, vector<12x2xf32> -> vector<12x2xf32>
    %c0_20 = arith.constant 0 : index
    %c0_21 = arith.constant 0 : index
    %111 = vector.load %arg8[%c0_20, %c0_21] : memref<12x1xf32, #tpu.memory_space<vmem>>, vector<12x1xf32>
    %112 = vector.broadcast %111 : vector<12x1xf32> to vector<12x2xf32>
    %113 = arith.addf %110, %112 : vector<12x2xf32>
    %114 = tpu.transpose %113, [1, 0] : vector<12x2xf32> -> vector<2x12xf32>
    %c0_22 = arith.constant 0 : index
    %c0_23 = arith.constant 0 : index
    %115 = vector.load %arg9[%c0_22, %c0_23] : memref<2x12xf32, #tpu.memory_space<vmem>>, vector<2x12xf32>
    tpu.vector_store %arg9[%c0_22, %c0_23], %114 {strides = array<i32>} : memref<2x12xf32, #tpu.memory_space<vmem>>, vector<2x12xf32>,
    return
  }
  func.func @transform_0(%arg0: i32) -> (i32, i32) {
    %c0_i32 = arith.constant 0 : i32
    %c0_i32_0 = arith.constant 0 : i32
    %c0_i32_1 = arith.constant 0 : i32
    return %c0_i32, %c0_i32_0 : i32, i32
  }
  func.func @transform_1(%arg0: i32) -> (i32, i32) {
    %c0_i32 = arith.constant 0 : i32
    %c0_i32_0 = arith.constant 0 : i32
    %c0_i32_1 = arith.constant 0 : i32
    return %c0_i32, %c0_i32_0 : i32, i32
  }
  func.func @transform_2(%arg0: i32) -> (i32, i32) {
    %c0_i32 = arith.constant 0 : i32
    %c0_i32_0 = arith.constant 0 : i32
    %c0_i32_1 = arith.constant 0 : i32
    return %c0_i32, %c0_i32_0 : i32, i32
  }
  func.func @transform_3(%arg0: i32) -> (i32, i32) {
    %c0_i32 = arith.constant 0 : i32
    %c0_i32_0 = arith.constant 0 : i32
    %c0_i32_1 = arith.constant 0 : i32
    return %c0_i32, %c0_i32_0 : i32, i32
  }
  func.func @transform_4(%arg0: i32) -> (i32, i32) {
    %c0_i32 = arith.constant 0 : i32
    %c0_i32_0 = arith.constant 0 : i32
    %c0_i32_1 = arith.constant 0 : i32
    return %c0_i32, %c0_i32_0 : i32, i32
  }
  func.func @transform_5(%arg0: i32) -> (i32, i32) {
    %c0_i32 = arith.constant 0 : i32
    %c0_i32_0 = arith.constant 0 : i32
    %c0_i32_1 = arith.constant 0 : i32
    return %c0_i32, %c0_i32_0 : i32, i32
  }
  func.func @transform_6(%arg0: i32) -> (i32, i32) {
    %c0_i32 = arith.constant 0 : i32
    %c0_i32_0 = arith.constant 0 : i32
    %c0_i32_1 = arith.constant 0 : i32
    return %c0_i32, %c0_i32_0 : i32, i32
  }
  func.func @transform_7(%arg0: i32) -> (i32, i32) {
    %c0_i32 = arith.constant 0 : i32
    %c0_i32_0 = arith.constant 0 : i32
    %c0_i32_1 = arith.constant 0 : i32
    return %c0_i32, %c0_i32_0 : i32, i32
  }
  func.func @transform_8(%arg0: i32) -> (i32, i32) {
    %c0_i32 = arith.constant 0 : i32
    %c0_i32_0 = arith.constant 0 : i32
    %c0_i32_1 = arith.constant 0 : i32
    return %c0_i32, %c0_i32_0 : i32, i32
  }
}

</mosaic_0001>

<bundles_post_ra>
// kernel: cnn_forward.1
= control target key start
LH: loop header
LB: loop body
LE: loop exit
PB: predicated region body
PF: predicated region fallthrough
CT: control target
= control target key end

     0   :  { %s2385_s0 = inlined_call_operand.vmem [shape: f32[8,768], index: 0, kind: input, shape index: {}]   ;;  %s2386_s1 = inlined_call_operand.vmem [shape: bf16[8,72], index: 1, kind: input, shape index: {}]   ;;  %s2387_s2 = inlined_call_operand.vmem [shape: f32[8,1], index: 2, kind: input, shape index: {}]   ;;  %s2388_s3 = inlined_call_operand.vmem [shape: bf16[324,128], index: 3, kind: input, shape index: {}]   ;;  %s2389_s4 = inlined_call_operand.vmem [shape: bf16[16,72], index: 4, kind: input, shape index: {}]   ;;  %s2390_s5 = inlined_call_operand.vmem [shape: f32[16,1], index: 5, kind: input, shape index: {}]   ;;  %s2391_s6 = inlined_call_operand.vmem [shape: f32[12,256], index: 6, kind: input, shape index: {}]   ;;  %s2392_s7 = inlined_call_operand.vmem [shape: f32[12,1], index: 7, kind: input, shape index: {}]   ;;  %s2393_s8 = inlined_call_operand.hbm [shape: f32[2,12], index: 8, kind: output, shape index: {}]  }
   0x1   :  { %v1892_v0 = vld [vmem:[%s2385_s0] sm:$0xff]  ;;  %v1897_v1 = vld [vmem:[%s2385_s0 + $0x8] sm:$0xff] }
   0x2   :  { %v1440_v2 = vpack.i.bf16 %v1897_v1, %v1892_v0 }
   0x3   :  { %13 = vsyncpa [#allocation3], 0  ;;  %s1799_s9 = smov 91   ;;  %s1800_s10 = smov 92   ;;  %v1906_v3 = vld [vmem:[%s2385_s0 + $0x10] sm:$0xff]  ;;  %v1911_v4 = vld [vmem:[%s2385_s0 + $0x18] sm:$0xff] }
   0x4   :  { %1441 = vrot.lane.b32.xlu2 %v1440_v2, %s1799_s9  ;;  %1431 = vrot.lane.b32.xlu1 %v1440_v2, %s1800_s10  ;;  %s1801_s11 = smov 90   ;;  %v1445_v5 = vpack.i.bf16 %v1911_v4, %v1906_v3  ;;  %s1802_s16 = smov 108   ;;  %v1921_v6 = vld [vmem:[%s2385_s0 + $0x20] sm:$0xff]  ;;  %v1926_v7 = vld [vmem:[%s2385_s0 + $0x28] sm:$0xff]  ;;  %vm223_vm0 = vcmask 736256   ;;  %vm276_vm1 = vcmask 1043456  }
   0x5   :  { %1421 = vrot.lane.b32.xlu0 %v1440_v2, %s1801_s11  ;;  %s1803_s17 = smov 109   ;;  %v1470_v8 = vpack.i.bf16 %v1926_v7, %v1921_v6  ;;  %s1804_s22 = smov 126   ;;  %v1520_v9 = vpack.i.bf16 %v1921_v6, %v1911_v4  ;;  %vm175_vm2 = vcmask 752640   ;;  %vm199_vm3 = vcmask 744448  }
   0x6   :  { %s1805_s23 = smov 110   ;;  %s1806_s24 = smov 127   ;;  %vm151_vm4 = vcmask 883712   ;;  %vm127_vm5 = vcmask 891904   ;;  %vm79_vm6 = vcmask 1031168   ;;  %vm103_vm7 = vcmask 900096  }
   0x7   :  { %vm55_vm8 = vcmask 1039360   ;;  %vm272_vm9 = vcmask 588800   ;;  %vm620_vm10 = vcmask 1041408   ;;  %s1808_s21 = smov 60   ;;  %vm616_vm11 = vcmask 556032   ;;  %s1810_s29 = smov 107  }
   0x8   :  { %vm678_vm12 = vcmask 490496   ;;  %vm734_vm13 = vcmask 89088   ;;  %s1811_s30 = smov 106   ;;  %s1813_s12 = smov 117   ;;  %vm796_vm14 = vcmask 867328   ;;  %vm788_vm15 = vcmask 875520  }
   0x9   :  { %s1814_s13 = smov 118   ;;  %s1818_s18 = smov 54  }
   0xa   :  { %s1819_s19 = smov 98   ;;  %s1820_s20 = smov 52  }
   0xb   :  { %s1823_s0 = smov 112   ;;  %s1825_s25 = smov 58  }
   0xc   :  { %1446 = vrot.lane.b32.xlu2 %v1445_v5, %s1799_s9  ;;  %1436 = vrot.lane.b32.xlu1 %v1445_v5, %s1800_s10  ;;  %s1827_s26 = smov 93   ;;  %s1829_s27 = smov 95  }
   0xd   :  { %1426 = vrot.lane.b32.xlu0 %v1445_v5, %s1801_s11  ;;  %s1830_s28 = smov 55   ;;  %s1835_s14 = smov 113  }
   0xe   :  { %s1836_s15 = smov 73  }
  0x14   :  { %1461 = vrot.lane.b32.xlu2 %v1440_v2, %s1802_s16  ;;  %1456 = vrot.lane.b32.xlu1 %v1445_v5, %s1803_s17 }
  0x15   :  { %1451 = vrot.lane.b32.xlu0 %v1440_v2, %s1803_s17 }
  0x1c   :  { %1476 = vrot.lane.b32.xlu2 %v1440_v2, %s1804_s22  ;;  %1471 = vrot.lane.b32.xlu1 %v1470_v8, %s1801_s11  ;;  %s1812_s11 = smov 116  }
  0x1d   :  { %1466 = vrot.lane.b32.xlu0 %v1445_v5, %s1802_s16 }
  0x24   :  { %1491 = vrot.lane.b32.xlu2 %v1445_v5, %s1805_s23  ;;  %1486 = vrot.lane.b32.xlu1 %v1440_v2, %s1805_s23 }
  0x25   :  { %1481 = vrot.lane.b32.xlu0 %v1445_v5, %s1804_s22 }
  0x2c   :  { %1506 = vrot.lane.b32.xlu2 %v1440_v2, %s1806_s24  ;;  %1501 = vrot.lane.b32.xlu1 %v1470_v8, %s1799_s9 }
  0x2d   :  { %1496 = vrot.lane.b32.xlu0 %v1470_v8, %s1800_s10 }
  0x34   :  { %1516 = vrot.lane.b32.xlu2 %v1470_v8, %s1802_s16  ;;  %1511 = vrot.lane.b32.xlu1 %v1470_v8, %s1803_s17  ;;  %s1840_s17 = smov 75  }
  0x35   :  { %47 = vrot.lane.b32.xlu0 %v1906_v3, %s1806_s24 }
  0x3c   :  { %99 = vrot.lane.b32.xlu1 %v1921_v6, %s1805_s23  ;;  %1521 = vrot.lane.b32.xlu2 %v1520_v9, %s1806_s24 }
  0x3d   :  { %75 = vrot.lane.b32.xlu0 %v1921_v6, %s1804_s22 }
  0x44   :  { %101 = vrot.lane.b32.xlu1 %v1926_v7, %s1805_s23  ;;  %53 = vrot.lane.b32.xlu2 %v1926_v7, %s1806_s24 }
  0x45   :  { %77 = vrot.lane.b32.xlu0 %v1926_v7, %s1804_s22 }
  0x5e   :  { %v1442_v10 = vpop.permute.xlu2 %1441 }
  0x5f   :  { %v1444_v17 = vunpack.i.h.bf16 %v1442_v10  ;;  %v1443_v18 = vunpack.i.l.bf16 %v1442_v10 }
  0x61   :  { %v200_v25 = vsel %vm199_vm3, %v1443_v18, %v1444_v17 }
  0x66   :  { %v1954_v11 = vpop.permute.xlu2 %1446 }
  0x67   :  { %v1448_v33 = vunpack.i.l.bf16 %v1954_v11 }
  0x69   :  { %v201_v41 = vsel %vm199_vm3, %v1444_v17, %v1448_v33 }
  0x6e   :  { %v1462_v12 = vpop.permute.xlu2 %1461 }
  0x6f   :  { %v1464_v35 = vunpack.i.h.bf16 %v1462_v12  ;;  %v1463_v36 = vunpack.i.l.bf16 %v1462_v12 }
  0x71   :  { %v152_v45 = vsel %vm151_vm4, %v1463_v36, %v1464_v35 }
  0x76   :  { %v1432_v13 = vpop.permute.xlu1 %1431  ;;  %v1962_v27 = vpop.permute.xlu2 %1476 }
  0x77   :  { %v1422_v14 = vpop.permute.xlu0 %1421  ;;  %v1434_v19 = vunpack.i.h.bf16 %v1432_v13  ;;  %v1433_v20 = vunpack.i.l.bf16 %v1432_v13  ;;  %v1479_v2 = vunpack.i.h.bf16 %v1962_v27  ;;  %v1478_v5 = vunpack.i.l.bf16 %v1962_v27 }
  0x78   :  { %v1424_v15 = vunpack.i.h.bf16 %v1422_v14  ;;  %v1423_v16 = vunpack.i.l.bf16 %v1422_v14  ;;  %v1449_v27 = vunpack.i.h.bf16 %v1954_v11 }
  0x79   :  { %v176_v24 = vsel %vm175_vm2, %v1433_v20, %v1434_v19 }
  0x7a   :  { %v224_v21 = vsel %vm223_vm0, %v1423_v16, %v1424_v15  ;;  %v254_v30 = vpack.c.bf16 %v200_v25, %v176_v24 }
  0x7b   :  { %v260_v22 = vpack.c.bf16 %v224_v21, %v224_v21 }
  0x7d   :  { %v278_v23 = vsel %vm276_vm1, %v260_v22, 0 }
  0x7e   :  { %298 = vmatpush.bf16.msra.mxu2 %v278_v23  ;;  %v1960_v26 = vpop.permute.xlu1 %1436  ;;  %v1982_v46 = vpop.permute.xlu2 %1491 }
  0x7f   :  { %v1964_v28 = vpop.permute.xlu0 %1426  ;;  %v1438_v31 = vunpack.i.l.bf16 %v1960_v26  ;;  %v1493_v10 = vunpack.i.l.bf16 %v1982_v46 }
  0x80   :  { %v1428_v29 = vunpack.i.l.bf16 %v1964_v28  ;;  %v1429_v51 = vunpack.i.h.bf16 %v1964_v28 }
  0x81   :  { %v177_v38 = vsel %vm175_vm2, %v1434_v19, %v1438_v31  ;;  %v80_v19 = vsel %vm79_vm6, %v1478_v5, %v1479_v2 }
  0x82   :  { %299 = vmatpush.bf16.msra.mxu2 %v254_v30  ;;  %v225_v32 = vsel %vm223_vm0, %v1424_v15, %v1428_v29  ;;  %v255_v44 = vpack.c.bf16 %v201_v41, %v177_v38  ;;  %v226_v23 = vsel %vm223_vm0, %v1428_v29, %v1429_v51  ;;  %v1494_v29 = vunpack.i.h.bf16 %v1982_v46 }
  0x83   :  { %v261_v34 = vpack.c.bf16 %v225_v32, %v225_v32 }
  0x85   :  { %v281_v37 = vsel %vm276_vm1, %v261_v34, 0  ;;  %v262_v34 = vpack.c.bf16 %v226_v23, %v226_v23 }
  0x86   :  { %311 = vmatpush.bf16.msra.mxu1 %v281_v37  ;;  %v1976_v39 = vpop.permute.xlu1 %1456  ;;  %v2001_v62 = vpop.permute.xlu2 %1506 }
  0x87   :  { %v1452_v40 = vpop.permute.xlu0 %1451  ;;  %v1458_v49 = vunpack.i.l.bf16 %v1976_v39  ;;  %v1509_v12 = vunpack.i.h.bf16 %v2001_v62  ;;  %v1508_v13 = vunpack.i.l.bf16 %v2001_v62 }
  0x88   :  { %v1454_v42 = vunpack.i.h.bf16 %v1452_v40  ;;  %v1453_v43 = vunpack.i.l.bf16 %v1452_v40 }
  0x89   :  { %v56_v22 = vsel %vm55_vm8, %v1508_v13, %v1509_v12 }
  0x8a   :  { %312 = vmatpush.bf16.msra.mxu1 %v255_v44  ;;  %v128_v47 = vsel %vm127_vm5, %v1453_v43, %v1454_v42  ;;  %v129_v58 = vsel %vm127_vm5, %v1454_v42, %v1458_v49  ;;  %v236_v32 = vpack.c.bf16 %v56_v22, %v1892_v0  ;;  %v202_v0 = vsel %vm199_vm3, %v1448_v33, %v1449_v27  ;;  %v2048_v44 = vld [vmem:[%s2386_s1] sm:$0xf]  ;;  %s1826_s1 = smov 74  }
  0x8b   :  { %v248_v48 = vpack.c.bf16 %v152_v45, %v128_v47  ;;  %v284_v43 = vsel %vm276_vm1, %v262_v34, 0 }
  0x8d   :  { %300 = vmatpush.bf16.msra.mxu2 %v248_v48  ;;  %v1459_v48 = vunpack.i.h.bf16 %v1976_v39 }
  0x8e   :  { %v1472_v50 = vpop.permute.xlu1 %1471  ;;  %v2030_v36 = vpop.permute.xlu2 %1516 }
  0x8f   :  { %v1987_v52 = vunpack.i.h.bf16 %v1472_v50  ;;  %v1473_v53 = vunpack.i.l.bf16 %v1472_v50  ;;  %v1989_v54 = vpop.permute.xlu0 %1466  ;;  %v130_v5 = vsel %vm127_vm5, %v1458_v49, %v1459_v48 }
  0x90   :  { %v1468_v55 = vunpack.i.l.bf16 %v1989_v54  ;;  %v1469_v45 = vunpack.i.h.bf16 %v1989_v54 }
  0x91   :  { %v227_v56 = vsel %vm223_vm0, %v1429_v51, %v1473_v53  ;;  %v228_v57 = vsel %vm223_vm0, %v1473_v53, %v1987_v52  ;;  %v266_v53 = vld [vmem:[%s2387_s2] sm:$0xff]  ;;  %v265_v54 = vpack.c.bf16 %v1987_v52, %v1987_v52  ;;  %vm773_vm0 = vcmask 949248   ;;  %s1828_s2 = smov 97  }
  0x92   :  { %v153_v59 = vsel %vm151_vm4, %v1464_v35, %v1468_v55  ;;  %v263_v60 = vpack.c.bf16 %v227_v56, %v227_v56  ;;  %v264_v61 = vpack.c.bf16 %v228_v57, %v228_v57  ;;  %v1439_v35 = vunpack.i.h.bf16 %v1960_v26 }
  0x93   :  { %v249_v63 = vpack.c.bf16 %v153_v59, %v129_v58  ;;  %v1519_v56 = vunpack.i.h.bf16 %v2030_v36  ;;  %v1807_v26 = vmov 0   ;;  %v293_v62 = vsel %vm276_vm1, %v265_v54, 0 }
  0x94   :  { %v287_v8 = vsel %vm276_vm1, %v263_v60, 0  ;;  %v290_v9 = vsel %vm276_vm1, %v264_v61, 0  ;;  %v178_v47 = vsel %vm175_vm2, %v1438_v31, %v1439_v35  ;;  %1525 = vset.pattern.permute.xlu0 %v1807_v26  ;;  %v1518_v31 = vunpack.i.l.bf16 %v2030_v36  ;;  %1591 = vset.pattern.permute.xlu2 %v1807_v26 }
  0x95   :  { %313 = vmatpush.bf16.msra.mxu1 %v249_v63  ;;  %337 = vmatpush.bf16.msra.mxu3 %v287_v8  ;;  %v256_v59 = vpack.c.bf16 %v202_v0, %v178_v47  ;;  %v154_v63 = vsel %vm151_vm4, %v1468_v55, %v1469_v45  ;;  %v106_v8 = vsel %vm103_vm7, %v1493_v10, %v1494_v29 }
  0x96   :  { %350 = vmatpush.bf16.msra.mxu0 %v290_v9  ;;  %v1487_v14 = vpop.permute.xlu1 %1486  ;;  %269 = vperm.xlu0 %1525, %v266_v53   ;;  %v1522_v61 = vpop.permute.xlu2 %1521  ;;  %v156_v55 = vsel %vm151_vm4, %v1518_v31, %v1519_v56  ;;  %v250_v49 = vpack.c.bf16 %v154_v63, %v130_v5 }
  0x97   :  { %v1489_v15 = vunpack.i.h.bf16 %v1487_v14  ;;  %v1488_v16 = vunpack.i.l.bf16 %v1487_v14  ;;  %v2010_v17 = vpop.permute.xlu0 %1481  ;;  %1772 = vset.pattern.permute.xlu1 %v1807_v26 }
  0x98   :  { %v1483_v18 = vunpack.i.l.bf16 %v2010_v17  ;;  %v1484_v60 = vunpack.i.h.bf16 %v2010_v17 }
  0x99   :  { %v104_v20 = vsel %vm103_vm7, %v1488_v16, %v1489_v15  ;;  %v105_v21 = vsel %vm103_vm7, %v1489_v15, %v1493_v10  ;;  %v1523_v15 = vunpack.i.l.bf16 %v1522_v61  ;;  %v155_v16 = vsel %vm151_vm4, %v1469_v45, %v1518_v31 }
  0x9a   :  { %v242_v24 = vpack.c.bf16 %v104_v20, %v80_v19  ;;  %v81_v25 = vsel %vm79_vm6, %v1479_v2, %v1483_v18  ;;  %v82_v52 = vsel %vm79_vm6, %v1483_v18, %v1484_v60 }
  0x9b   :  { %v243_v30 = vpack.c.bf16 %v105_v21, %v81_v25  ;;  %v244_v23 = vpack.c.bf16 %v106_v8, %v82_v52 }
  0x9c   :  { %301 = vmatpush.bf16.msra.mxu2 %v242_v24 }
  0x9d   :  { %314 = vmatpush.bf16.msra.mxu1 %v243_v30 }
  0x9e   :  { %v2032_v28 = vpop.permute.xlu1 %1501 }
  0x9f   :  { %v1504_v37 = vunpack.i.h.bf16 %v2032_v28  ;;  %v1503_v38 = vunpack.i.l.bf16 %v2032_v28  ;;  %v2037_v40 = vpop.permute.xlu0 %1496  ;;  %v54_v28 = vpop.permute.xlu2 %53 }
  0xa0   :  { %v1499_v41 = vunpack.i.h.bf16 %v2037_v40  ;;  %v1498_v42 = vunpack.i.l.bf16 %v2037_v40  ;;  %302 = vmatpush.bf16.msra.mxu2 %v236_v32 }
  0xa1   :  { %v203_v11 = vsel %vm199_vm3, %v1449_v27, %v1503_v38  ;;  %v204_v33 = vsel %vm199_vm3, %v1503_v38, %v1504_v37  ;;  %vm1347_vm3 = vmneg %vm734_vm13 }
  0xa2   :  { %v179_v50 = vsel %vm175_vm2, %v1439_v35, %v1498_v42  ;;  %v180_v51 = vsel %vm175_vm2, %v1498_v42, %v1499_v41  ;;  %v259_v17 = vpack.c.bf16 %v1504_v37, %v1499_v41  ;;  %vm765_vm2 = vcmask 957440  }
  0xa3   :  { %v257_v57 = vpack.c.bf16 %v203_v11, %v179_v50  ;;  %v258_v58 = vpack.c.bf16 %v204_v33, %v180_v51  ;;  %1255 = vmatmul.msk.bf16.vlgmr.msra.gmra.mxu2 %vm272_vm9, %v2048_v44 }
  0xa4   :  { %324 = vmatpush.bf16.msrb.mxu2 %v284_v43 }
  0xa5   :  { %338 = vmatpush.bf16.msra.mxu3 %v257_v57  ;;  %351 = vmatpush.bf16.msra.mxu0 %v258_v58 }
  0xa6   :  { %v1512_v2 = vpop.permute.xlu1 %1511 }
  0xa7   :  { %v1514_v9 = vunpack.i.h.bf16 %v1512_v2  ;;  %v1513_v13 = vunpack.i.l.bf16 %v1512_v2  ;;  %v48_v14 = vpop.permute.xlu0 %47 }
  0xa8   :  { %325 = vmatpush.bf16.msrb.mxu2 %v256_v59  ;;  %v57_v39 = vsel %vm55_vm8, %v1509_v12, %v48_v14  ;;  %v1524_v12 = vunpack.i.h.bf16 %v1522_v61 }
  0xa9   :  { %v237_v19 = vpack.c.bf16 %v57_v39, %v1897_v1  ;;  %v131_v10 = vsel %vm127_vm5, %v1459_v48, %v1513_v13  ;;  %v132_v20 = vsel %vm127_vm5, %v1513_v13, %v1514_v9  ;;  %v58_v1 = vsel %vm55_vm8, %v48_v14, %v1523_v15 }
  0xaa   :  { %v251_v21 = vpack.c.bf16 %v155_v16, %v131_v10  ;;  %v252_v22 = vpack.c.bf16 %v156_v55, %v132_v20  ;;  %v238_v30 = vpack.c.bf16 %v58_v1, %v1906_v3  ;;  %v59_v32 = vsel %vm55_vm8, %v1523_v15, %v1524_v12 }
  0xab   :  { %315 = vmatpush.bf16.msra.mxu1 %v237_v19  ;;  %v253_v35 = vpack.c.bf16 %v1519_v56, %v1514_v9  ;;  %v239_v36 = vpack.c.bf16 %v59_v32, %v1911_v4  ;;  %v60_v0 = vsel %vm55_vm8, %v1524_v12, %v54_v28  ;;  %v241_v4 = vpack.c.bf16 %v54_v28, %v1926_v7  ;;  %v489_v32 = vld [vmem:[%s2388_s3 + $0xa0] sm:$0x3] }
  0xac   :  { %326 = vmatpush.bf16.msrb.mxu2 %v250_v49  ;;  %339 = vmatpush.bf16.msra.mxu3 %v251_v21  ;;  %v240_v41 = vpack.c.bf16 %v60_v0, %v1921_v6  ;;  %v1371_v0 = vld [vmem:[%s2388_s3 + $0x90] sm:$0xff] }
  0xad   :  { %352 = vmatpush.bf16.msra.mxu0 %v252_v22 }
  0xae   :  { %v100_v24 = vpop.permute.xlu1 %99  ;;  %1256 = vmatmul.msk.bf16.vlgmr.msra.gmra.mxu1 %vm272_vm9, %v2048_v44 }
  0xaf   :  { %363 = vmatpush.bf16.msrb.mxu1 %v293_v62  ;;  %v107_v18 = vsel %vm103_vm7, %v1494_v29, %v100_v24  ;;  %v76_v25 = vpop.permute.xlu0 %75 }
  0xb0   :  { %327 = vmatpush.bf16.msrb.mxu2 %v244_v23  ;;  %v83_v27 = vsel %vm79_vm6, %v1484_v60, %v76_v25 }
  0xb1   :  { %v245_v34 = vpack.c.bf16 %v107_v18, %v83_v27  ;;  %v1360_v27 = vld [vmem:[%s2388_s3 + $0x38] sm:$0xff] }
  0xb3   :  { %364 = vmatpush.bf16.msrb.mxu1 %v259_v17  ;;  %340 = vmatpush.bf16.msra.mxu3 %v245_v34  ;;  %v1359_v34 = vld [vmem:[%s2388_s3 + $0x30] sm:$0xff] }
  0xb4   :  { %328 = vmatpush.bf16.msrb.mxu2 %v238_v30  ;;  %v1368_v30 = vld [vmem:[%s2388_s3 + $0x78] sm:$0xff] }
  0xb6   :  { %v102_v46 = vpop.permute.xlu1 %101 }
  0xb7   :  { %365 = vmatpush.bf16.msrb.mxu1 %v253_v35  ;;  %1257 = vmatmul.msk.bf16.vlgmr.msrb.gmra.mxu2 %vm272_vm9, %v2048_v44  ;;  %v108_v29 = vsel %vm103_vm7, %v100_v24, %v102_v46  ;;  %v78_v37 = vpop.permute.xlu0 %77  ;;  %v1367_v35 = vld [vmem:[%s2388_s3 + $0x70] sm:$0xff] }
  0xb8   :  { %341 = vmatpush.bf16.msra.mxu3 %v239_v36  ;;  %v84_v3 = vsel %vm79_vm6, %v76_v25, %v78_v37  ;;  %v247_v38 = vpack.c.bf16 %v102_v46, %v78_v37  ;;  %624 = vmatpush.bf16.msra.mxu2 %v1360_v27  ;;  %v574_v36 = vunpack.c.l.b16 %v489_v32  ;;  %v1366_v37 = vld [vmem:[%s2388_s3 + $0x68] sm:$0xff] }
  0xb9   :  { %v246_v40 = vpack.c.bf16 %v108_v29, %v84_v3  ;;  %v1358_v29 = vld [vmem:[%s2388_s3 + $0x28] sm:$0xff]  ;;  %v1372_v3 = vld [vmem:[%s2388_s3 + $0x98] sm:$0xff] }
  0xba   :  { %v595_v46 = vpack.c.b16 %v574_v36, %v574_v36 }
  0xbb   :  { %1258 = vmatmul.msk.bf16.vlgmr.msra.gmra.mxu3 %vm272_vm9, %v2048_v44  ;;  %366 = vmatpush.bf16.msrb.mxu1 %v247_v38  ;;  %v1357_v38 = vld [vmem:[%s2388_s3 + $0x20] sm:$0xff] }
  0xbc   :  { %353 = vmatpush.bf16.msra.mxu0 %v246_v40  ;;  %637 = vmatpush.bf16.msrb.mxu3 %v1368_v30  ;;  %v622_v28 = vsel %vm620_vm10, %v595_v46, 0  ;;  %v1365_v40 = vld [vmem:[%s2388_s3 + $0x60] sm:$0xff] }
  0xbd   :  { %625 = vmatpush.bf16.msra.mxu2 %v1359_v34 }
  0xbf   :  { %367 = vmatpush.bf16.msrb.mxu1 %v241_v4 }
  0xc0   :  { %354 = vmatpush.bf16.msra.mxu0 %v240_v41  ;;  %638 = vmatpush.bf16.msrb.mxu3 %v1367_v35  ;;  %v1356_v41 = vld [vmem:[%s2388_s3 + $0x18] sm:$0xff] }
  0xc1   :  { %626 = vmatpush.bf16.msra.mxu2 %v1358_v29 }
  0xc2   :  { %1260 = vmatmul.msk.bf16.vlgmr.msrb.gmra.mxu1 %vm272_vm9, %v2048_v44 }
  0xc3   :  { %1259 = vmatmul.msk.bf16.vlgmr.msra.gmra.mxu0 %vm272_vm9, %v2048_v44  ;;  %687 = vmatpush.bf16.msra.mxu1 %v1360_v27 }
  0xc4   :  { %653 = vmatpush.bf16.msrb.mxu0 %v622_v28  ;;  %639 = vmatpush.bf16.msrb.mxu3 %v1366_v37 }
  0xc5   :  { %627 = vmatpush.bf16.msra.mxu2 %v1357_v38 }
  0xc7   :  { %688 = vmatpush.bf16.msra.mxu1 %v1359_v34 }
  0xc8   :  { %654 = vmatpush.bf16.msrb.mxu0 %v1372_v3  ;;  %640 = vmatpush.bf16.msrb.mxu3 %v1365_v40 }
  0xc9   :  { %628 = vmatpush.bf16.msra.mxu2 %v1356_v41 }
  0xcb   :  { %689 = vmatpush.bf16.msra.mxu1 %v1358_v29 }
  0xcc   :  { %655 = vmatpush.bf16.msrb.mxu0 %v1371_v0 }
  0xcf   :  { %690 = vmatpush.bf16.msra.mxu1 %v1357_v38 }
  0xd3   :  { %691 = vmatpush.bf16.msra.mxu1 %v1356_v41  ;;  %v812_v41 = vld [vmem:[%s2390_s5] sm:$0xff] }
 0x108   :  { %v270_v47 = vpop.permute.xlu0 %269 }
 0x126   :  { %v304_v42 = vpop.f32.mrf.mxu2 }
 0x127   :  { %v305_v26 = vadd.f32 %v304_v42, %v270_v47  ;;  %v1364_v42 = vld [vmem:[%s2388_s3 + $0x58] sm:$0xff] }
 0x128   :  { %641 = vmatpush.bf16.msrb.mxu3 %v1364_v42 }
 0x129   :  { %v373_v61 = vmax.f32 %v305_v26, 0.0 }
 0x12b   :  { %v317_v43 = vpop.f32.mrf.mxu1 }
 0x12c   :  { %v318_v31 = vadd.f32 %v317_v43, %v270_v47  ;;  %v1370_v43 = vld [vmem:[%s2388_s3 + $0x88] sm:$0xff] }
 0x12d   :  { %656 = vmatpush.bf16.msrb.mxu0 %v1370_v43 }
 0x12e   :  { %v306_v45 = vpop.f32.mrf.mxu2  ;;  %v374_v63 = vmax.f32 %v318_v31, 0.0 }
 0x130   :  { %v1531_v9 = vpack.i.bf16 %v374_v63, %v373_v61 }
 0x133   :  { %v319_v11 = vpop.f32.mrf.mxu1 }
 0x13a   :  { %v330_v33 = vpop.f32.mrf.mxu2 }
 0x13b   :  { %v331_v8 = vadd.f32 %v330_v33, %v270_v47  ;;  %v1355_v33 = vld [vmem:[%s2388_s3 + $0x10] sm:$0xff] }
 0x13c   :  { %629 = vmatpush.bf16.msra.mxu2 %v1355_v33  ;;  %692 = vmatpush.bf16.msra.mxu1 %v1355_v33 }
 0x13d   :  { %v375_v13 = vmax.f32 %v331_v8, 0.0 }
 0x13e   :  { %v343_v48 = vpop.f32.mrf.mxu3 }
 0x13f   :  { %v369_v50 = vpop.f32.mrf.mxu1  ;;  %v344_v7 = vadd.f32 %v343_v48, %v270_v47  ;;  %v1369_v48 = vld [vmem:[%s2388_s3 + $0x80] sm:$0xff] }
 0x140   :  { %v370_v51 = vadd.f32 %v369_v50, %v270_v47  ;;  %v356_v53 = vpop.f32.mrf.mxu0  ;;  %657 = vmatpush.bf16.msrb.mxu0 %v1369_v48  ;;  %v1354_v50 = vld [vmem:[%s2388_s3 + $0x8] sm:$0xff] }
 0x141   :  { %v357_v6 = vadd.f32 %v356_v53, %v270_v47  ;;  %v376_v56 = vmax.f32 %v344_v7, 0.0  ;;  %v1363_v47 = vld [vmem:[%s2388_s3 + $0x50] sm:$0xff]  ;;  %v1362_v7 = vld [vmem:[%s2388_s3 + $0x48] sm:$0xff]  ;;  %630 = vmatpush.bf16.msra.mxu2 %v1354_v50  ;;  %693 = vmatpush.bf16.msra.mxu1 %v1354_v50  ;;  %v1361_v53 = vld [vmem:[%s2388_s3 + $0x40] sm:$0xff] }
 0x142   :  { %v332_v57 = vpop.f32.mrf.mxu2  ;;  %v378_v58 = vmax.f32 %v370_v51, 0.0  ;;  %642 = vmatpush.bf16.msrb.mxu3 %v1363_v47  ;;  %v1353_v51 = vld [vmem:[%s2388_s3] sm:$0xff]  ;;  %s1809_s3 = smov 11  }
 0x143   :  { %v377_v59 = vmax.f32 %v357_v6, 0.0 }
 0x144   :  { %395 = vrot.lane.b32.xlu2 %v378_v58, %s1806_s24 }
 0x145   :  { %v1526_v44 = vpack.i.bf16 %v377_v59, %v376_v56  ;;  %631 = vmatpush.bf16.msra.mxu2 %v1353_v51  ;;  %694 = vmatpush.bf16.msra.mxu1 %v1353_v51 }
 0x146   :  { %v345_v60 = vpop.f32.mrf.mxu3  ;;  %643 = vmatpush.bf16.msrb.mxu3 %v1362_v7 }
 0x147   :  { %1527 = vrot.lane.b32.xlu1 %v1526_v44, %s1806_s24  ;;  %v371_v2 = vpop.f32.mrf.mxu1 }
 0x148   :  { %v358_v5 = vpop.f32.mrf.mxu0 }
 0x149   :  { %700 = vmatpush.bf16.msrb.mxu2 %v1368_v30 }
 0x14a   :  { %644 = vmatpush.bf16.msrb.mxu3 %v1361_v53 }
 0x14c   :  { %1532 = vrot.lane.b32.xlu2 %v1531_v9, %s1806_s24 }
 0x14d   :  { %701 = vmatpush.bf16.msrb.mxu2 %v1367_v35 }
 0x14e   :  { %716 = vmatpush.bf16.msra.mxu3 %v622_v28 }
 0x14f   :  { %389 = vrot.lane.b32.xlu1 %v375_v13, %s1806_s24 }
 0x151   :  { %702 = vmatpush.bf16.msrb.mxu2 %v1366_v37 }
 0x152   :  { %717 = vmatpush.bf16.msra.mxu3 %v1372_v3 }
 0x155   :  { %703 = vmatpush.bf16.msrb.mxu2 %v1365_v40 }
 0x156   :  { %718 = vmatpush.bf16.msra.mxu3 %v1371_v0 }
 0x159   :  { %704 = vmatpush.bf16.msrb.mxu2 %v1364_v42  ;;  %v813_v42 = vld [vmem:[%s2390_s5 + $0x8] sm:$0xff]  ;;  %s1841_s5 = smov 77  }
 0x15a   :  { %719 = vmatpush.bf16.msra.mxu3 %v1370_v43 }
 0x15d   :  { %705 = vmatpush.bf16.msrb.mxu2 %v1363_v47 }
 0x15e   :  { %720 = vmatpush.bf16.msra.mxu3 %v1369_v48 }
 0x161   :  { %706 = vmatpush.bf16.msrb.mxu2 %v1362_v7 }
 0x165   :  { %707 = vmatpush.bf16.msrb.mxu2 %v1361_v53 }
 0x19e   :  { %v396_v14 = vpop.permute.xlu2 %395 }
 0x19f   :  { %v413_v54 = vmax.f32 %v378_v58, %v396_v14 }
 0x1a1   :  { %430 = vrot.lane.b32.xlu1 %v413_v54, %s1805_s23 }
 0x1a6   :  { %v1533_v49 = vpop.permute.xlu2 %1532 }
 0x1a7   :  { %v1535_v52 = vunpack.i.h.bf16 %v1533_v49  ;;  %v1534_v21 = vunpack.i.l.bf16 %v1533_v49 }
 0x1a9   :  { %v397_v12 = vsel %vm55_vm8, %v1534_v21, %v1535_v52 }
 0x1aa   :  { %v2142_v18 = vmax.f32 %v373_v61, %v397_v12 }
 0x1b9   :  { %v1528_v55 = vpop.permute.xlu1 %1527 }
 0x1ba   :  { %v1530_v15 = vunpack.i.h.bf16 %v1528_v55  ;;  %v1529_v39 = vunpack.i.l.bf16 %v1528_v55 }
 0x1bc   :  { %v400_v16 = vsel %vm55_vm8, %v1529_v39, %v1530_v15  ;;  %v401_v19 = vsel %vm55_vm8, %v1530_v15, %v396_v14 }
 0x1bd   :  { %v2126_v10 = vmax.f32 %v376_v56, %v400_v16  ;;  %v2128_v20 = vmax.f32 %v377_v59, %v401_v19 }
 0x1bf   :  { %v1536_v22 = vpack.i.bf16 %v2128_v20, %v2126_v10 }
 0x1c1   :  { %1537 = vrot.lane.b32.xlu0 %v1536_v22, %s1805_s23  ;;  %v390_v62 = vpop.permute.xlu1 %389 }
 0x1c2   :  { %v398_v23 = vsel %vm55_vm8, %v1535_v52, %v390_v62  ;;  %v399_v1 = vsel %vm55_vm8, %v390_v62, %v1529_v39 }
 0x1c3   :  { %v2136_v24 = vmax.f32 %v374_v63, %v398_v23  ;;  %v2138_v17 = vmax.f32 %v375_v13, %v399_v1 }
 0x1c5   :  { %424 = vrot.lane.b32.xlu2 %v2138_v17, %s1805_s23  ;;  %v1541_v25 = vpack.i.bf16 %v2136_v24, %v2142_v18 }
 0x1c9   :  { %1542 = vrot.lane.b32.xlu0 %v1541_v25, %s1805_s23  ;;  %s1822_s23 = smov 56  }
 0x213   :  { %v431_v4 = vpop.permute.xlu1 %430 }
 0x214   :  { %v448_v45 = vmax.f32 %v413_v54, %v431_v4 }
 0x216   :  { %v665_v11 = vpack.c.bf16 %v448_v45, %v448_v45 }
 0x218   :  { %676 = vrot.lane.b32.xlu0 %v665_v11, %s1808_s21 }
 0x21f   :  { %v425_v58 = vpop.permute.xlu2 %424 }
 0x233   :  { %v1538_v6 = vpop.permute.xlu0 %1537 }
 0x234   :  { %v1540_v56 = vunpack.i.h.bf16 %v1538_v6  ;;  %v1539_v57 = vunpack.i.l.bf16 %v1538_v6 }
 0x236   :  { %v434_v26 = vsel %vm103_vm7, %v425_v58, %v1539_v57  ;;  %v435_v31 = vsel %vm103_vm7, %v1539_v57, %v1540_v56  ;;  %v436_v59 = vsel %vm103_vm7, %v1540_v56, %v431_v4 }
 0x237   :  { %v445_v44 = vmax.f32 %v2138_v17, %v434_v26  ;;  %v446_v60 = vmax.f32 %v2126_v10, %v435_v31  ;;  %v447_v61 = vmax.f32 %v2128_v20, %v436_v59 }
 0x239   :  { %v663_v63 = vpack.c.bf16 %v446_v60, %v446_v60  ;;  %v664_v2 = vpack.c.bf16 %v447_v61, %v447_v61  ;;  %v492_v5 = vpack.c.bf16 %v445_v44, %v445_v44 }
 0x23b   :  { %672 = vrot.lane.b32.xlu1 %v663_v63, %s1808_s21  ;;  %674 = vrot.lane.b32.xlu2 %v664_v2, %s1808_s21  ;;  %v1543_v8 = vpop.permute.xlu0 %1542 }
 0x23c   :  { %1341 = vmatmul.msk.bf16.vlgmr.msrb.gmra.mxu0 %vm616_vm11, %v492_v5  ;;  %v1545_v9 = vunpack.i.h.bf16 %v1543_v8  ;;  %v1544_v13 = vunpack.i.l.bf16 %v1543_v8 }
 0x23e   :  { %v432_v14 = vsel %vm103_vm7, %v1544_v13, %v1545_v9  ;;  %v433_v54 = vsel %vm103_vm7, %v1545_v9, %v425_v58  ;;  %vm1237_vm7 = vcmask 91136  }
 0x23f   :  { %v443_v55 = vmax.f32 %v2142_v18, %v432_v14  ;;  %v444_v15 = vmax.f32 %v2136_v24, %v433_v54 }
 0x241   :  { %v490_v39 = vpack.c.bf16 %v443_v55, %v443_v55  ;;  %v491_v49 = vpack.c.bf16 %v444_v15, %v444_v15 }
 0x243   :  { %670 = vrot.lane.b32.xlu1 %v492_v5, %s1808_s21  ;;  %632 = vmatmul.bf16.vlgmr.msra.gmra.mxu2 %v490_v39  ;;  %s1821_s21 = smov 114  }
 0x244   :  { %645 = vmatmul.bf16.vlgmr.msrb.gmra.mxu3 %v491_v49 }
 0x28a   :  { %v677_v16 = vpop.permute.xlu0 %676 }
 0x295   :  { %v675_v19 = vpop.permute.xlu2 %674 }
 0x296   :  { %v681_v10 = vsel %vm678_vm12, %v675_v19, %v677_v16 }
 0x297   :  { %1342 = vmatmul.msk.bf16.vlgmr.msra.gmra.mxu3 %vm616_vm11, %v681_v10 }
 0x2ad   :  { %v673_v20 = vpop.permute.xlu1 %672 }
 0x2ae   :  { %v680_v52 = vsel %vm678_vm12, %v673_v20, %v675_v19 }
 0x2af   :  { %708 = vmatmul.bf16.vlgmr.msrb.gmra.mxu2 %v680_v52 }
 0x2b5   :  { %v671_v21 = vpop.permute.xlu1 %670 }
 0x2b6   :  { %v679_v22 = vsel %vm678_vm12, %v671_v21, %v673_v20 }
 0x2b7   :  { %695 = vmatmul.bf16.vlgmr.msra.gmra.mxu1 %v679_v22 }
 0x2b9   :  { %v659_v62 = vpop.f32.mrf.mxu0 }
 0x2c1   :  { %v661_v12 = vpop.f32.mrf.mxu0 }
 0x2c6   :  { %v633_v23 = vpop.f32.mrf.mxu2 }
 0x2c7   :  { %v646_v1 = vpop.f32.mrf.mxu3 }
 0x2c8   :  { %v647_v24 = vadd.f32 %v646_v1, %v633_v23 }
 0x2ca   :  { %v660_v17 = vadd.f32 %v659_v62, %v647_v24 }
 0x2ce   :  { %v635_v18 = vpop.f32.mrf.mxu2 }
 0x2cf   :  { %v648_v25 = vpop.f32.mrf.mxu3 }
 0x31a   :  { %v722_v27 = vpop.f32.mrf.mxu3 }
 0x322   :  { %v724_v30 = vpop.f32.mrf.mxu3 }
 0x332   :  { %v709_v32 = vpop.f32.mrf.mxu2 }
 0x334   :  { %v696_v34 = vpop.f32.mrf.mxu1 }
 0x335   :  { %v710_v35 = vadd.f32 %v709_v32, %v696_v34 }
 0x337   :  { %v723_v36 = vadd.f32 %v722_v27, %v710_v35 }
 0x339   :  { %v1546_v46 = vpack.i.bf16 %v723_v36, %v660_v17  ;;  %v1373_v17 = vld [vmem:[%s2389_s4] sm:$0xff]  ;;  %s1816_s4 = smov 96  }
 0x33a   :  { %v711_v28 = vpop.f32.mrf.mxu2 }
 0x33b   :  { %1547 = vrot.lane.b32.xlu2 %v1546_v46, %s1809_s3  ;;  %s1831_s3 = smov 51  }
 0x33c   :  { %v698_v29 = vpop.f32.mrf.mxu1 }
 0x395   :  { %v1548_v37 = vpop.permute.xlu2 %1547 }
 0x396   :  { %v1550_v3 = vunpack.i.h.bf16 %v1548_v37  ;;  %v2226_v38 = vunpack.i.l.bf16 %v1548_v37 }
 0x398   :  { %v735_v40 = vsel %vm734_vm13, 0.0, %v2226_v38  ;;  %v2232_v0 = vsel %vm734_vm13, %v2226_v38, %v1550_v3 }
 0x399   :  { %v1561_v4 = vpack.i.bf16 %v2232_v0, %v735_v40 }
 0x39b   :  { %1562 = vrot.lane.b32.xlu2 %v1561_v4, %s1810_s29  ;;  %1557 = vrot.lane.b32.xlu1 %v1561_v4, %s1802_s16  ;;  %s1832_s29 = smov 53   ;;  %s1838_s16 = smov 71  }
 0x39c   :  { %1552 = vrot.lane.b32.xlu0 %v1561_v4, %s1811_s30  ;;  %s1833_s30 = smov 115  }
 0x3a3   :  { %1577 = vrot.lane.b32.xlu2 %v1561_v4, %s1804_s22  ;;  %1572 = vrot.lane.b32.xlu1 %v1561_v4, %s1812_s11  ;;  %s1842_s22 = smov 78  }
 0x3a4   :  { %1567 = vrot.lane.b32.xlu0 %v1561_v4, %s1813_s12 }
 0x3ab   :  { %1587 = vrot.lane.b32.xlu1 %v1561_v4, %s1806_s24  ;;  %821 = vperm.xlu2 %1591, %v813_v42  }
 0x3ac   :  { %1582 = vrot.lane.b32.xlu0 %v1561_v4, %s1814_s13 }
 0x3b4   :  { %816 = vperm.xlu0 %1525, %v812_v41  }
 0x3f5   :  { %v1563_v45 = vpop.permute.xlu2 %1562 }
 0x3f6   :  { %v1565_v7 = vunpack.i.h.bf16 %v1563_v45  ;;  %v1564_v51 = vunpack.i.l.bf16 %v1563_v45 }
 0x3f8   :  { %v789_v59 = vsel %vm788_vm15, %v1564_v51, %v1565_v7 }
 0x3fd   :  { %v1578_v54 = vpop.permute.xlu2 %1577 }
 0x3fe   :  { %v1580_v15 = vunpack.i.h.bf16 %v1578_v54  ;;  %v1579_v39 = vunpack.i.l.bf16 %v1578_v54 }
 0x400   :  { %v750_v22 = vsel %vm79_vm6, %v1579_v39, %v1580_v15  ;;  %vm930_vm6 = vcmask 7168  }
 0x405   :  { %v822_v46 = vpop.permute.xlu2 %821 }
 0x40d   :  { %v1558_v43 = vpop.permute.xlu1 %1557 }
 0x40e   :  { %v1553_v11 = vpop.permute.xlu0 %1552  ;;  %v1560_v48 = vunpack.i.h.bf16 %v1558_v43  ;;  %v1559_v50 = vunpack.i.l.bf16 %v1558_v43 }
 0x40f   :  { %v1555_v33 = vunpack.i.h.bf16 %v1553_v11  ;;  %v1554_v47 = vunpack.i.l.bf16 %v1553_v11 }
 0x410   :  { %v781_v26 = vsel %vm151_vm4, %v1559_v50, %v1560_v48  ;;  %v809_v44 = vpack.c.bf16 %v1565_v7, %v1560_v48  ;;  %vm1815_vm4 = vmmov 1  }
 0x411   :  { %v811_v53 = vpack.c.bf16 %v1555_v33, %v1555_v33  ;;  %v797_v6 = vsel %vm796_vm14, %v1554_v47, %v1555_v33  ;;  %v808_v8 = vpack.c.bf16 %v789_v59, %v781_v26  ;;  %vm1348_vm5 = vmpackc.low %vm1815_vm4, %vm1347_vm3 }
 0x412   :  { %v810_v56 = vpack.c.bf16 %v797_v6, %v797_v6 }
 0x413   :  { %v836_v57 = vsel %vm276_vm1, %v811_v53, 0 }
 0x414   :  { %855 = vmatpush.bf16.msrb.mxu1 %v836_v57  ;;  %v833_v58 = vsel %vm276_vm1, %v810_v56, 0  ;;  %vm757_vm1 = vcmask 965632  }
 0x415   :  { %841 = vmatpush.bf16.msra.mxu0 %v833_v58  ;;  %v1573_v31 = vpop.permute.xlu1 %1572 }
 0x416   :  { %v1575_v60 = vunpack.i.h.bf16 %v1573_v31  ;;  %v1574_v61 = vunpack.i.l.bf16 %v1573_v31  ;;  %v1568_v63 = vpop.permute.xlu0 %1567 }
 0x417   :  { %v1570_v2 = vunpack.i.h.bf16 %v1568_v63  ;;  %v1569_v5 = vunpack.i.l.bf16 %v1568_v63 }
 0x418   :  { %856 = vmatpush.bf16.msrb.mxu1 %v809_v44  ;;  %v774_v9 = vsel %vm773_vm0, %v1574_v61, %v1575_v60 }
 0x419   :  { %v807_v13 = vpack.c.bf16 %v1575_v60, %v1570_v2  ;;  %842 = vmatpush.bf16.msra.mxu0 %v808_v8  ;;  %v766_v14 = vsel %vm765_vm2, %v1569_v5, %v1570_v2 }
 0x41a   :  { %v806_v55 = vpack.c.bf16 %v774_v9, %v766_v14 }
 0x41c   :  { %857 = vmatpush.bf16.msrb.mxu1 %v807_v13  ;;  %v1148_v13 = vld [vmem:[%s2392_s7 + $0x8] sm:$0xf] }
 0x41d   :  { %843 = vmatpush.bf16.msra.mxu0 %v806_v55  ;;  %v1588_v49 = vpop.permute.xlu1 %1587 }
 0x41e   :  { %v1583_v16 = vpop.permute.xlu0 %1582  ;;  %v1590_v19 = vunpack.i.h.bf16 %v1588_v49  ;;  %v1589_v10 = vunpack.i.l.bf16 %v1588_v49 }
 0x41f   :  { %v1585_v20 = vunpack.i.h.bf16 %v1583_v16  ;;  %v1584_v52 = vunpack.i.l.bf16 %v1583_v16 }
 0x420   :  { %v743_v23 = vsel %vm55_vm8, %v1589_v10, %v1590_v19  ;;  %v803_v1 = vpack.c.bf16 %v1590_v19, %v2232_v0 }
 0x421   :  { %v805_v21 = vpack.c.bf16 %v1585_v20, %v1580_v15  ;;  %v758_v62 = vsel %vm757_vm1, %v1584_v52, %v1585_v20  ;;  %v1349_v24 = vpack.c.bf16 %v743_v23, %v2226_v38 }
 0x422   :  { %v804_v12 = vpack.c.bf16 %v758_v62, %v750_v22 }
 0x423   :  { %858 = vmatpush.bf16.msrb.mxu1 %v805_v21 }
 0x424   :  { %844 = vmatpush.bf16.msra.mxu0 %v804_v12 }
 0x426   :  { %v817_v18 = vpop.permute.xlu0 %816 }
 0x427   :  { %859 = vmatpush.bf16.msrb.mxu1 %v803_v1 }
 0x428   :  { %1350 = vmatpush.bf16.msk.msra.mxu0 %vm1348_vm5, %v1349_v24 }
 0x42a   :  { %1352 = vmatmul.msk.bf16.vlgmr.msrb.gmra.mxu1 %vm272_vm9, %v1373_v17 }
 0x42b   :  { %1351 = vmatmul.msk.bf16.vlgmr.msra.gmra.mxu0 %vm272_vm9, %v1373_v17 }
 0x4a7   :  { %v861_v25 = vpop.f32.mrf.mxu1 }
 0x4a8   :  { %v862_v27 = vadd.f32 %v861_v25, %v817_v18  ;;  %v847_v30 = vpop.f32.mrf.mxu0 }
 0x4a9   :  { %v848_v32 = vadd.f32 %v847_v30, %v817_v18 }
 0x4aa   :  { %v867_v34 = vmax.f32 %v862_v27, 0.0 }
 0x4ab   :  { %v866_v35 = vmax.f32 %v848_v32, 0.0 }
 0x4ad   :  { %v1597_v36 = vpack.i.bf16 %v867_v34, %v866_v35 }
 0x4af   :  { %v863_v28 = vpop.f32.mrf.mxu1  ;;  %1598 = vrot.lane.b32.xlu2 %v1597_v36, %s1806_s24 }
 0x4b0   :  { %v864_v29 = vadd.f32 %v863_v28, %v822_v46  ;;  %v849_v37 = vpop.f32.mrf.mxu0 }
 0x4b1   :  { %v850_v3 = vadd.f32 %v849_v37, %v822_v46 }
 0x4b2   :  { %v869_v38 = vmax.f32 %v864_v29, 0.0 }
 0x4b3   :  { %v868_v40 = vmax.f32 %v850_v3, 0.0 }
 0x4b5   :  { %v1592_v0 = vpack.i.bf16 %v869_v38, %v868_v40 }
 0x4b7   :  { %1593 = vrot.lane.b32.xlu1 %v1592_v0, %s1806_s24  ;;  %s1817_s24 = smov 94  }
 0x509   :  { %v1599_v4 = vpop.permute.xlu2 %1598 }
 0x50a   :  { %v1601_v41 = vunpack.i.h.bf16 %v1599_v4  ;;  %v1600_v42 = vunpack.i.l.bf16 %v1599_v4 }
 0x50c   :  { %v889_v43 = vmax.f32 %v867_v34, %v1601_v41  ;;  %v882_v45 = vsel %vm55_vm8, %v1600_v42, %v1601_v41 }
 0x50d   :  { %v888_v11 = vmax.f32 %v866_v35, %v882_v45 }
 0x50f   :  { %v1602_v33 = vpack.i.bf16 %v889_v43, %v888_v11 }
 0x511   :  { %1603 = vrot.lane.b32.xlu1 %v1602_v33, %s1814_s13 }
 0x529   :  { %v1594_v47 = vpop.permute.xlu1 %1593 }
 0x52a   :  { %v1596_v48 = vunpack.i.h.bf16 %v1594_v47  ;;  %v1595_v50 = vunpack.i.l.bf16 %v1594_v47 }
 0x52c   :  { %v891_v7 = vmax.f32 %v869_v38, %v1596_v48  ;;  %v883_v51 = vsel %vm55_vm8, %v1595_v50, %v1596_v48 }
 0x52d   :  { %v890_v53 = vmax.f32 %v868_v40, %v883_v51 }
 0x52f   :  { %v1607_v6 = vpack.i.bf16 %v891_v7, %v890_v53 }
 0x531   :  { %1608 = vrot.lane.b32.xlu0 %v1607_v6, %s1814_s13 }
 0x583   :  { %v1604_v56 = vpop.permute.xlu1 %1603 }
 0x584   :  { %v1606_v57 = vunpack.i.h.bf16 %v1604_v56  ;;  %v1605_v61 = vunpack.i.l.bf16 %v1604_v56 }
 0x586   :  { %v911_v31 = vmax.f32 %v889_v43, %v1606_v57  ;;  %v904_v2 = vsel %vm757_vm1, %v1605_v61, %v1606_v57 }
 0x587   :  { %v910_v8 = vmax.f32 %v888_v11, %v904_v2 }
 0x5a3   :  { %v1609_v58 = vpop.permute.xlu0 %1608 }
 0x5a4   :  { %v1611_v26 = vunpack.i.h.bf16 %v1609_v58  ;;  %v1610_v60 = vunpack.i.l.bf16 %v1609_v58 }
 0x5a6   :  { %v913_v59 = vmax.f32 %v891_v7, %v1611_v26  ;;  %v905_v63 = vsel %vm757_vm1, %v1610_v60, %v1611_v26 }
 0x5a7   :  { %v912_v5 = vmax.f32 %v890_v53, %v905_v63 }
 0x5a8   :  { %v2267_v44 = vpack.i.bf16 %v911_v31, %v913_v59 }
 0x5a9   :  { %v1687_v9 = vpack.i.bf16 %v910_v8, %v912_v5 }
 0x5aa   :  { %1623 = vrot.lane.b32.xlu1 %v2267_v44, %s1816_s4  ;;  %1618 = vrot.lane.b32.xlu2 %v2267_v44, %s1817_s24 }
 0x5ab   :  { %1613 = vrot.lane.b32.xlu0 %v2267_v44, %s1800_s10  ;;  %s1824_s10 = smov 72  }
 0x5b2   :  { %1638 = vrot.lane.b32.xlu1 %v2267_v44, %s1818_s18  ;;  %1633 = vrot.lane.b32.xlu2 %v2267_v44, %s1819_s19 }
 0x5b3   :  { %1628 = vrot.lane.b32.xlu0 %v2267_v44, %s1820_s20 }
 0x5ba   :  { %1653 = vrot.lane.b32.xlu1 %v2267_v44, %s1821_s21  ;;  %1648 = vrot.lane.b32.xlu2 %v2267_v44, %s1822_s23 }
 0x5bb   :  { %1643 = vrot.lane.b32.xlu0 %v2267_v44, %s1823_s0 }
 0x5c2   :  { %1668 = vrot.lane.b32.xlu1 %v2267_v44, %s1824_s10  ;;  %1663 = vrot.lane.b32.xlu2 %v2267_v44, %s1812_s11  ;;  %s1834_s11 = smov 111  }
 0x5c3   :  { %1658 = vrot.lane.b32.xlu0 %v2267_v44, %s1825_s25 }
 0x5ca   :  { %1678 = vrot.lane.b32.xlu2 %v2267_v44, %s1826_s1  ;;  %1688 = vrot.lane.b32.xlu1 %v1687_v9, %s1827_s26  ;;  %s1843_s1 = smov [#allocation2]  }
 0x5cb   :  { %1673 = vrot.lane.b32.xlu0 %v2267_v44, %s1814_s13  ;;  %s1837_s13 = smov 57   ;;  %s1244_s26 = sshll.u32 %s1843_s1, 4  ;;  %s1245_s26 = int_to_ptr.vmem [resolvable:$true] %s1244_s26 }
 0x5d2   :  { %1703 = vrot.lane.b32.xlu1 %v1687_v9, %s1828_s2  ;;  %1683 = vrot.lane.b32.xlu2 %v1687_v9, %s1799_s9  ;;  %s1839_s9 = smov 76  }
 0x5d3   :  { %1693 = vrot.lane.b32.xlu0 %v1687_v9, %s1829_s27 }
 0x5da   :  { %1718 = vrot.lane.b32.xlu1 %v1687_v9, %s1830_s28  ;;  %1698 = vrot.lane.b32.xlu2 %v1687_v9, %s1831_s3  ;;  %s1246_s28 = sshll.u32 %s2393_s8, 4  ;;  %s1247_s28 = int_to_ptr.hbm [resolvable:$true] %s1246_s28 }
 0x5db   :  { %1708 = vrot.lane.b32.xlu0 %v1687_v9, %s1832_s29 }
 0x5e2   :  { %1733 = vrot.lane.b32.xlu1 %v1687_v9, %s1833_s30  ;;  %1713 = vrot.lane.b32.xlu2 %v1687_v9, %s1834_s11 }
 0x5e3   :  { %1723 = vrot.lane.b32.xlu0 %v1687_v9, %s1835_s14 }
 0x5ea   :  { %1748 = vrot.lane.b32.xlu1 %v1687_v9, %s1836_s15  ;;  %1728 = vrot.lane.b32.xlu2 %v1687_v9, %s1837_s13 }
 0x5eb   :  { %1738 = vrot.lane.b32.xlu0 %v1687_v9, %s1838_s16 }
 0x5f2   :  { %1753 = vrot.lane.b32.xlu1 %v2267_v44, %s1839_s9  ;;  %1743 = vrot.lane.b32.xlu2 %v1687_v9, %s1813_s12 }
 0x5f3   :  { %1758 = vrot.lane.b32.xlu0 %v1687_v9, %s1840_s17 }
 0x5fa   :  { %1763 = vrot.lane.b32.xlu2 %v1687_v9, %s1841_s5 }
 0x5fb   :  { %1768 = vrot.lane.b32.xlu0 %v2267_v44, %s1842_s22 }
 0x602   :  { %1156 = vperm.xlu2 %1591, %v1148_v13  }
 0x604   :  { %v1619_v14 = vpop.permute.xlu2 %1618 }
 0x605   :  { %v1620_v28 = vunpack.i.l.bf16 %v1619_v14  ;;  %v1621_v38 = vunpack.i.h.bf16 %v1619_v14 }
 0x60c   :  { %v2295_v54 = vpop.permute.xlu2 %1633 }
 0x60d   :  { %v1635_v50 = vunpack.i.l.bf16 %v2295_v54  ;;  %v1636_v53 = vunpack.i.h.bf16 %v2295_v54 }
 0x614   :  { %v2297_v55 = vpop.permute.xlu2 %1648 }
 0x615   :  { %v1650_v14 = vunpack.i.l.bf16 %v2297_v55 }
 0x61c   :  { %v1624_v15 = vpop.permute.xlu1 %1623  ;;  %v2299_v39 = vpop.permute.xlu2 %1663 }
 0x61d   :  { %v1614_v49 = vpop.permute.xlu0 %1613  ;;  %v1625_v43 = vunpack.i.l.bf16 %v1624_v15  ;;  %v1626_v33 = vunpack.i.h.bf16 %v1624_v15 }
 0x61e   :  { %v1615_v21 = vunpack.i.l.bf16 %v1614_v49  ;;  %v1616_v23 = vunpack.i.h.bf16 %v1614_v49 }
 0x624   :  { %v2301_v16 = vpop.permute.xlu1 %1638  ;;  %v2303_v19 = vpop.permute.xlu2 %1678 }
 0x625   :  { %v1629_v10 = vpop.permute.xlu0 %1628  ;;  %v1640_v58 = vunpack.i.l.bf16 %v2301_v16  ;;  %v1641_v63 = vunpack.i.h.bf16 %v2301_v16  ;;  %v1651_v16 = vunpack.i.h.bf16 %v2297_v55 }
 0x626   :  { %v1630_v25 = vunpack.i.l.bf16 %v1629_v10  ;;  %v1631_v34 = vunpack.i.h.bf16 %v1629_v10 }
 0x62c   :  { %v2305_v20 = vpop.permute.xlu1 %1653  ;;  %v1684_v52 = vpop.permute.xlu2 %1683 }
 0x62d   :  { %v2307_v22 = vpop.permute.xlu0 %1643  ;;  %v1686_v62 = vunpack.i.h.bf16 %v1684_v52  ;;  %v1685_v12 = vunpack.i.l.bf16 %v1684_v52 }
 0x62e   :  { %v1645_v26 = vunpack.i.l.bf16 %v2307_v22  ;;  %v1646_v5 = vunpack.i.h.bf16 %v2307_v22  ;;  %v1655_v22 = vunpack.i.l.bf16 %v2305_v20 }
 0x62f   :  { %v1030_v1 = vsel %vm930_vm6, %v1685_v12, %v1615_v21  ;;  %v1029_v24 = vsel %vm930_vm6, %v1686_v62, %v1616_v23 }
 0x630   :  { %1159 = vmatpush.msrb.mxu3 %v1030_v1 }
 0x632   :  { %1160 = vmatpush.msrb.mxu3 %v1029_v24 }
 0x634   :  { %v2311_v17 = vpop.permute.xlu1 %1668  ;;  %v1699_v18 = vpop.permute.xlu2 %1698 }
 0x635   :  { %v2313_v27 = vpop.permute.xlu0 %1658  ;;  %v1701_v30 = vunpack.i.h.bf16 %v1699_v18  ;;  %v1700_v32 = vunpack.i.l.bf16 %v1699_v18 }
 0x636   :  { %v1660_v62 = vunpack.i.l.bf16 %v2313_v27  ;;  %v1661_v55 = vunpack.i.h.bf16 %v2313_v27 }
 0x637   :  { %v1142_v35 = vsel %vm930_vm6, %v1700_v32, %v1630_v25  ;;  %v1141_v36 = vsel %vm930_vm6, %v1701_v30, %v1631_v34  ;;  %v1656_v25 = vunpack.i.h.bf16 %v2305_v20  ;;  %v1666_v20 = vunpack.i.h.bf16 %v2299_v39 }
 0x638   :  { %1182 = vmatpush.msrb.mxu0 %v1142_v35 }
 0x63a   :  { %1183 = vmatpush.msrb.mxu0 %v1141_v36  ;;  %v1665_v36 = vunpack.i.l.bf16 %v2299_v39 }
 0x63c   :  { %v1689_v46 = vpop.permute.xlu1 %1688  ;;  %v1714_v41 = vpop.permute.xlu2 %1713 }
 0x63d   :  { %v2317_v29 = vpop.permute.xlu0 %1673  ;;  %v1691_v37 = vunpack.i.h.bf16 %v1689_v46  ;;  %v1690_v3 = vunpack.i.l.bf16 %v1689_v46  ;;  %v1715_v6 = vunpack.i.l.bf16 %v1714_v41  ;;  %v1716_v59 = vunpack.i.h.bf16 %v1714_v41 }
 0x63f   :  { %v1016_v40 = vsel %vm930_vm6, %v1690_v3, %v1620_v28  ;;  %v1015_v0 = vsel %vm930_vm6, %v1691_v37, %v1621_v38  ;;  %v974_v9 = vsel %vm930_vm6, %v1715_v6, %v1645_v26  ;;  %v973_v15 = vsel %vm930_vm6, %v1716_v59, %v1646_v5 }
 0x640   :  { %1161 = vmatpush.msrb.mxu3 %v1016_v40  ;;  %v1147_v40 = vld [vmem:[%s2392_s7] sm:$0xff] }
 0x641   :  { %1151 = vperm.xlu1 %1772, %v1147_v40  }
 0x642   :  { %1162 = vmatpush.msrb.mxu3 %v1015_v0  ;;  %v1670_v0 = vunpack.i.l.bf16 %v2311_v17 }
 0x644   :  { %v1704_v4 = vpop.permute.xlu1 %1703  ;;  %v1729_v2 = vpop.permute.xlu2 %1728 }
 0x645   :  { %v1694_v42 = vpop.permute.xlu0 %1693  ;;  %v1705_v47 = vunpack.i.l.bf16 %v1704_v4  ;;  %v1706_v7 = vunpack.i.h.bf16 %v1704_v4  ;;  %v1730_v10 = vunpack.i.l.bf16 %v1729_v2  ;;  %v1731_v23 = vunpack.i.h.bf16 %v1729_v2 }
 0x646   :  { %v1696_v45 = vunpack.i.h.bf16 %v1694_v42  ;;  %v1695_v11 = vunpack.i.l.bf16 %v1694_v42  ;;  %v1675_v4 = vunpack.i.l.bf16 %v2317_v29 }
 0x647   :  { %v988_v57 = vsel %vm930_vm6, %v1705_v47, %v1635_v50  ;;  %v987_v61 = vsel %vm930_vm6, %v1706_v7, %v1636_v53  ;;  %v1100_v34 = vsel %vm930_vm6, %v1730_v10, %v1660_v62  ;;  %v1099_v37 = vsel %vm930_vm6, %v1731_v23, %v1661_v55  ;;  %v1143_v7 = vld [vmem:[%s2391_s6] sm:$0xff] }
 0x648   :  { %v1002_v48 = vsel %vm930_vm6, %v1695_v11, %v1625_v43  ;;  %v1001_v51 = vsel %vm930_vm6, %v1696_v45, %v1626_v33  ;;  %v1671_v11 = vunpack.i.h.bf16 %v2311_v17  ;;  %v1676_v33 = vunpack.i.h.bf16 %v2317_v29 }
 0x649   :  { %1163 = vmatpush.msrb.mxu3 %v1002_v48  ;;  %v1681_v29 = vunpack.i.h.bf16 %v2303_v19 }
 0x64b   :  { %1164 = vmatpush.msrb.mxu3 %v1001_v51  ;;  %v1680_v51 = vunpack.i.l.bf16 %v2303_v19  ;;  %v1145_v19 = vld [vmem:[%s2391_s6 + $0x10] sm:$0xf] }
 0x64c   :  { %v1719_v56 = vpop.permute.xlu1 %1718  ;;  %v1744_v35 = vpop.permute.xlu2 %1743 }
 0x64d   :  { %v1709_v31 = vpop.permute.xlu0 %1708  ;;  %1165 = vmatpush.msrb.mxu3 %v988_v57  ;;  %v1720_v8 = vunpack.i.l.bf16 %v1719_v56  ;;  %v1721_v54 = vunpack.i.h.bf16 %v1719_v56  ;;  %v1745_v27 = vunpack.i.l.bf16 %v1744_v35  ;;  %v1746_v42 = vunpack.i.h.bf16 %v1744_v35 }
 0x64e   :  { %v1711_v44 = vunpack.i.h.bf16 %v1709_v31  ;;  %v1710_v60 = vunpack.i.l.bf16 %v1709_v31 }
 0x64f   :  { %1166 = vmatpush.msrb.mxu3 %v987_v61  ;;  %v1114_v21 = vsel %vm930_vm6, %v1720_v8, %v1650_v14  ;;  %v1113_v18 = vsel %vm930_vm6, %v1721_v54, %v1651_v16  ;;  %v932_v48 = vsel %vm930_vm6, %v1745_v27, %v1675_v4  ;;  %v931_v6 = vsel %vm930_vm6, %v1746_v42, %v1676_v33  ;;  %v1146_v16 = vld [vmem:[%s2391_s6 + $0x18] sm:$0xf] }
 0x650   :  { %v1128_v13 = vsel %vm930_vm6, %v1710_v60, %v1640_v58  ;;  %v1127_v49 = vsel %vm930_vm6, %v1711_v44, %v1641_v63 }
 0x651   :  { %1167 = vmatpush.msrb.mxu3 %v974_v9  ;;  %1184 = vmatpush.msrb.mxu0 %v1128_v13 }
 0x653   :  { %1168 = vmatpush.msrb.mxu3 %v973_v15  ;;  %1185 = vmatpush.msrb.mxu0 %v1127_v49  ;;  %v1144_v15 = vld [vmem:[%s2391_s6 + $0x8] sm:$0xff] }
 0x654   :  { %v1734_v52 = vpop.permute.xlu1 %1733  ;;  %v1764_v2 = vpop.permute.xlu2 %1763 }
 0x655   :  { %v1724_v12 = vpop.permute.xlu0 %1723  ;;  %1186 = vmatpush.msrb.mxu0 %v1114_v21  ;;  %v1735_v30 = vunpack.i.l.bf16 %v1734_v52  ;;  %v1736_v46 = vunpack.i.h.bf16 %v1734_v52  ;;  %v1765_v8 = vunpack.i.l.bf16 %v1764_v2  ;;  %v1766_v14 = vunpack.i.h.bf16 %v1764_v2 }
 0x656   :  { %v1726_v1 = vunpack.i.h.bf16 %v1724_v12  ;;  %v1725_v24 = vunpack.i.l.bf16 %v1724_v12 }
 0x657   :  { %1187 = vmatpush.msrb.mxu0 %v1113_v18  ;;  %v946_v38 = vsel %vm930_vm6, %v1735_v30, %v1665_v36  ;;  %v945_v39 = vsel %vm930_vm6, %v1736_v46, %v1666_v20 }
 0x658   :  { %v960_v32 = vsel %vm930_vm6, %v1725_v24, %v1655_v22  ;;  %v959_v28 = vsel %vm930_vm6, %v1726_v1, %v1656_v25 }
 0x659   :  { %1169 = vmatpush.msrb.mxu3 %v960_v32  ;;  %1188 = vmatpush.msrb.mxu0 %v1100_v34 }
 0x65b   :  { %1170 = vmatpush.msrb.mxu3 %v959_v28  ;;  %1189 = vmatpush.msrb.mxu0 %v1099_v37 }
 0x65c   :  { %v1749_v3 = vpop.permute.xlu1 %1748  ;;  %v1157_v23 = vpop.permute.xlu2 %1156 }
 0x65d   :  { %v1739_v41 = vpop.permute.xlu0 %1738  ;;  %1171 = vmatpush.msrb.mxu3 %v946_v38  ;;  %v1750_v47 = vunpack.i.l.bf16 %v1749_v3  ;;  %v1751_v53 = vunpack.i.h.bf16 %v1749_v3 }
 0x65e   :  { %v1741_v43 = vunpack.i.h.bf16 %v1739_v41  ;;  %v1740_v45 = vunpack.i.l.bf16 %v1739_v41 }
 0x65f   :  { %1172 = vmatpush.msrb.mxu3 %v945_v39  ;;  %v1072_v57 = vsel %vm930_vm6, %v1750_v47, %v1680_v51  ;;  %v1071_v60 = vsel %vm930_vm6, %v1751_v53, %v1681_v29 }
 0x660   :  { %v1086_v50 = vsel %vm930_vm6, %v1740_v45, %v1670_v0  ;;  %v1085_v17 = vsel %vm930_vm6, %v1741_v43, %v1671_v11 }
 0x661   :  { %1173 = vmatpush.msrb.mxu3 %v932_v48  ;;  %1190 = vmatpush.msrb.mxu0 %v1086_v50 }
 0x663   :  { %1174 = vmatpush.msrb.mxu3 %v931_v6  ;;  %1191 = vmatpush.msrb.mxu0 %v1085_v17 }
 0x664   :  { %1175 = vmatmul.f32.vlgmr.msrb.gmra.mxu3 %v1143_v7  ;;  %v1754_v56 = vpop.permute.xlu1 %1753 }
 0x665   :  { %v1759_v58 = vpop.permute.xlu0 %1758  ;;  %v1755_v26 = vunpack.i.l.bf16 %v1754_v56  ;;  %1192 = vmatpush.msrb.mxu0 %v1072_v57  ;;  %v1756_v44 = vunpack.i.h.bf16 %v1754_v56 }
 0x666   :  { %v1761_v31 = vunpack.i.h.bf16 %v1759_v58  ;;  %v1760_v59 = vunpack.i.l.bf16 %v1759_v58 }
 0x667   :  { %1193 = vmatpush.msrb.mxu0 %v1071_v60 }
 0x668   :  { %v1058_v61 = vsel %vm930_vm6, %v1760_v59, %v1755_v26  ;;  %v1057_v63 = vsel %vm930_vm6, %v1761_v31, %v1756_v44 }
 0x669   :  { %1194 = vmatpush.msrb.mxu0 %v1058_v61 }
 0x66b   :  { %1195 = vmatpush.msrb.mxu0 %v1057_v63 }
 0x66c   :  { %1178 = vmatmul.f32.gmra.mxu3 %v1145_v19 }
 0x66d   :  { %v1769_v5 = vpop.permute.xlu0 %1768 }
 0x66e   :  { %v1771_v9 = vunpack.i.h.bf16 %v1769_v5  ;;  %v1770_v13 = vunpack.i.l.bf16 %v1769_v5 }
 0x670   :  { %v1044_v54 = vsel %vm930_vm6, %v1765_v8, %v1770_v13  ;;  %v1043_v49 = vsel %vm930_vm6, %v1766_v14, %v1771_v9 }
 0x671   :  { %1196 = vmatpush.msrb.mxu0 %v1044_v54 }
 0x673   :  { %1197 = vmatpush.msrb.mxu0 %v1043_v49 }
 0x674   :  { %1198 = vmatmul.f32.vlgmr.msrb.gmra.mxu0 %v1144_v15 }
 0x67c   :  { %1201 = vmatmul.f32.gmra.mxu0 %v1146_v16 }
 0x6b3   :  { %v1152_v52 = vpop.permute.xlu1 %1151 }
 0x6e7   :  { %v1176_v10 = vpop.f32.mrf.mxu3 }
 0x6e8   :  { %v1177_v21 = vadd.f32 %v1176_v10, %v1152_v52 }
 0x6ef   :  { %v1179_v12 = vpop.f32.mrf.mxu3 }
 0x6f0   :  { %v1180_v1 = vadd.f32 %v1179_v12, %v1157_v23 }
 0x6f1   :  { %v1199_v22 = vpop.f32.mrf.mxu0 }
 0x6f2   :  { %v1200_v62 = vadd.f32 %v1199_v22, %v1177_v21 }
 0x6f4   :  { %1205 = vxpose.xlu0.b32.start [1/2] (short) (narrow) %v1200_v62, 8 }
 0x6f9   :  { %v1202_v24 = vpop.f32.mrf.mxu0 }
 0x6fa   :  { %v1203_v18 = vadd.f32 %v1202_v24, %v1180_v1 }
 0x6fc   :  { %1206 = vxpose.xlu0.b32.end [2/2] (short) (narrow) %v1203_v18, 8 }
 0x798   :  { %v1221_v25 = vpop.trf.xlu0 }
 0x799   :  { %1238 = vst.msk [vmem:[#allocation2] sm:$0x3] %vm1237_vm7, %v1221_v25 }
 0x79a   :  { %1249 = dma.vmem_to_hbm [thread:$0]  %s1245_s26, 32, %s1247_s28, [#allocation3]  }
 0x79b   :  { %1797 = dma.done.wait [#allocation3], 32  }
 0x79c   :  { %1798 = vsyncadd [#allocation3], 4294967264 }
 0x79d   :  { %1254 = vsyncpa [#allocation3], 1 }

</bundles_post_ra>
